<compile_context>
chip_gen: v5e
topology: v5e:2x2
jax: 0.10.0
libtpu: 0.0.40
codegen_flags: <defaults>
</compile_context>

<pallas_src>
import jax
import jax.numpy as jnp
from jax.experimental import pallas as pl
from jax.experimental.pallas import tpu as pltpu


def _round_up(x, m):
    return ((x + m - 1) // m) * m


def ncf_kernel(u_ref, i_ref, w1u_ref, w1i_ref, b1_ref, w2_ref, b2_ref,
               wfcg_ref, wfcm_ref, bfc_ref, out_ref):
    E = w2_ref.shape[1]

    # Static slices of the fused [gmf | mlp] embedding tiles.
    u_gmf = u_ref[:, pl.ds(0, E)]      # (TB, E) bf16
    u_mlp = u_ref[:, pl.ds(E, E)]      # (TB, E) bf16
    i_gmf = i_ref[:, pl.ds(0, E)]      # (TB, E) bf16
    i_mlp = i_ref[:, pl.ds(E, E)]      # (TB, E) bf16

    # GMF branch: elementwise product (VPU), accumulate in f32.
    h_gmf = u_gmf.astype(jnp.float32) * i_gmf.astype(jnp.float32)      # (TB, E)

    # MLP branch, concat-free: h1 = [u_mlp | i_mlp] @ w1 + b1 with w1 pre-split.
    h1 = (jnp.dot(u_mlp, w1u_ref[...], preferred_element_type=jnp.float32)
          + jnp.dot(i_mlp, w1i_ref[...], preferred_element_type=jnp.float32)
          + b1_ref[...])
    h1 = jnp.maximum(h1, 0.0)                                           # (TB, H)

    # Linear(H -> E), identity activation.
    h2 = jnp.dot(h1.astype(w2_ref.dtype), w2_ref[...],
                 preferred_element_type=jnp.float32) + b2_ref[...]      # (TB, E)

    # Final fc(2E -> 1) + sigmoid, concat-free and MXU-free:
    #   logits = h_gmf . wfc[:E] + h2 . wfc[E:] + bfc   (VPU mul + lane reduce)
    logits = (jnp.sum(h_gmf * wfcg_ref[...], axis=-1, keepdims=True)
              + jnp.sum(h2 * wfcm_ref[...], axis=-1, keepdims=True)
              + bfc_ref[0, 0])                                          # (TB, 1)
    out_ref[...] = jax.nn.sigmoid(logits)


def item_ncf_forward(u_idx, i_idx, params, *, tb_max=2048):
    """u_idx, i_idx: int32 [B, 1] index tensors (matches the PyTorch squeeze(dim=1))."""
    E = params["w2"].shape[1]
    H = params["w1"].shape[1]

    # --- glue: fused embedding gather (one gather per entity) ---
    u_emb = params["user_embed"][u_idx[:, 0]]     # (B, 2E)  [gmf | mlp], bf16
    i_emb = params["item_embed"][i_idx[:, 0]]     # (B, 2E)  [gmf | mlp], bf16
    B = u_emb.shape[0]

    # --- pre-split small weights once, outside the kernel ---
    w1 = params["w1"]                              # (2E, H) bf16
    w1u, w1i = w1[:E], w1[E:]                      # (E, H) each
    w2 = params["w2"]                              # (H, E) bf16
    b1 = params["b1"].astype(jnp.float32)          # (1, H)
    b2 = params["b2"].astype(jnp.float32)          # (1, E)
    wfc = params["wfc"].astype(jnp.float32)        # (2E, 1)
    wfc_g = wfc[:E].T                              # (1, E)
    wfc_m = wfc[E:].T                              # (1, E)
    bfc = params["bfc"].astype(jnp.float32).reshape(1, 1)

    # --- batch tiling: TB rows per grid step, pad B up to a multiple of TB ---
    TB = min(tb_max, _round_up(B, 256))
    B_pad = _round_up(B, TB)
    if B_pad != B:
        pad = ((0, B_pad - B), (0, 0))
        u_emb = jnp.pad(u_emb, pad)
        i_emb = jnp.pad(i_emb, pad)
    grid = (B_pad // TB,)

    emb_bytes = u_emb.dtype.itemsize
    cost = pl.CostEstimate(
        flops=int(B_pad) * (6 * E * H + 8 * E + 2 * H),
        transcendentals=int(B_pad),
        bytes_accessed=int(B_pad) * (4 * E * emb_bytes + 4)
                       + (4 * E * H + 2 * H + 4 * E + 4) * 4,
    )

    bcast = lambda shape: pl.BlockSpec(shape, lambda b: (0,) * len(shape))

    out = pl.pallas_call(
        ncf_kernel,
        out_shape=jax.ShapeDtypeStruct((B_pad, 1), jnp.float32),
        grid=grid,
        in_specs=[
            pl.BlockSpec((TB, 2 * E), lambda b: (b, 0)),    # user embeddings
            pl.BlockSpec((TB, 2 * E), lambda b: (b, 0)),    # item embeddings
            bcast((E, H)), bcast((E, H)), bcast((1, H)),    # w1 (split), b1
            bcast((H, E)), bcast((1, E)),                   # w2, b2
            bcast((1, E)), bcast((1, E)),                   # wfc (split)
            pl.BlockSpec(memory_space=pltpu.MemorySpace.SMEM),  # bfc scalar
        ],
        out_specs=pl.BlockSpec((TB, 1), lambda b: (b, 0)),
        compiler_params=pltpu.CompilerParams(dimension_semantics=("parallel",)),
        cost_estimate=cost,
    )(u_emb, i_emb, w1u, w1i, b1, w2, b2, wfc_g, wfc_m, bfc)
    return out[:B]


def item_ncf_reference(u_idx, i_idx, params):
    """Pure-JAX reference (same math as the PyTorch module) for a sanity check."""
    E = params["w2"].shape[1]
    u = params["user_embed"][u_idx[:, 0]].astype(jnp.float32)
    it = params["item_embed"][i_idx[:, 0]].astype(jnp.float32)
    h_gmf = u[:, :E] * it[:, :E]
    h_mlp = jnp.concatenate([u[:, E:], it[:, E:]], axis=-1)
    h1 = jnp.maximum(h_mlp @ params["w1"].astype(jnp.float32)
                     + params["b1"].astype(jnp.float32), 0.0)
    h2 = h1 @ params["w2"].astype(jnp.float32) + params["b2"].astype(jnp.float32)
    h = jnp.concatenate([h_gmf, h2], axis=-1)
    logits = h @ params["wfc"].astype(jnp.float32) + params["bfc"].astype(jnp.float32)
    return jax.nn.sigmoid(logits)


def init_params(key, n_user, n_item, embed_dim=32, hidden_dim=64,
                param_dtype=jnp.bfloat16):
    ks = jax.random.split(key, 10)

    def xavier_normal(k, shape):
        fan_in, fan_out = shape
        std = (2.0 / (fan_in + fan_out)) ** 0.5
        return std * jax.random.normal(k, shape, dtype=jnp.float32)

    def linear_init(kw, kb, fan_in, fan_out):
        bound = 1.0 / (fan_in ** 0.5)
        w = jax.random.uniform(kw, (fan_in, fan_out), minval=-bound, maxval=bound,
                               dtype=jnp.float32)
        b = jax.random.uniform(kb, (1, fan_out), minval=-bound, maxval=bound,
                               dtype=jnp.float32)
        return w, b

    # Fused [gmf | mlp] embedding tables (one gather / one HBM stream per entity).
    user_embed = jnp.concatenate(
        [xavier_normal(ks[0], (n_user, embed_dim)),
         xavier_normal(ks[2], (n_user, embed_dim))], axis=1)
    item_embed = jnp.concatenate(
        [xavier_normal(ks[1], (n_item, embed_dim)),
         xavier_normal(ks[3], (n_item, embed_dim))], axis=1)

    w1, b1 = linear_init(ks[4], ks[5], 2 * embed_dim, hidden_dim)
    w2, b2 = linear_init(ks[6], ks[7], hidden_dim, embed_dim)
    wfc, bfc = linear_init(ks[8], ks[9], 2 * embed_dim, 1)

    return {
        "user_embed": user_embed.astype(param_dtype),
        "item_embed": item_embed.astype(param_dtype),
        "w1": w1.astype(param_dtype), "b1": b1.astype(jnp.float32),
        "w2": w2.astype(param_dtype), "b2": b2.astype(jnp.float32),
        "wfc": wfc.astype(jnp.float32), "bfc": bfc.astype(jnp.float32),
    }


if __name__ == "__main__":
    key = jax.random.PRNGKey(0)
    n_user, n_item = 16, 24
    embed_dim, hidden_dim = 32, 64
    B = 2

    pkey, ukey, ikey = jax.random.split(key, 3)
    params = init_params(pkey, n_user, n_item, embed_dim, hidden_dim)

    # inputs = (u, i, _): int index tensors of shape (B, 1)
    u = jax.random.randint(ukey, (B, 1), 0, n_user, dtype=jnp.int32)
    i = jax.random.randint(ikey, (B, 1), 0, n_item, dtype=jnp.int32)

    pred = item_ncf_forward(u, i, params)
    jax.block_until_ready(pred)

    assert pred.shape == (B, 1)
    assert bool(jnp.all((pred >= 0.0) & (pred <= 1.0)))

    ref = item_ncf_reference(u, i, params)
    assert bool(jnp.all(jnp.abs(pred - ref) < 2e-2)), (pred, ref)

    print("KERNEL_OK")
</pallas_src>

<mosaic_0001>
module attributes {stable_mosaic.version = 11 : i64} {
  func.func @ncf_kernel(%arg0: i32, %arg1: memref<256x64xbf16, #tpu.memory_space<vmem>>, %arg2: memref<256x64xbf16, #tpu.memory_space<vmem>>, %arg3: memref<32x64xbf16, #tpu.memory_space<vmem>>, %arg4: memref<32x64xbf16, #tpu.memory_space<vmem>>, %arg5: memref<1x64xf32, #tpu.memory_space<vmem>>, %arg6: memref<64x32xbf16, #tpu.memory_space<vmem>>, %arg7: memref<1x32xf32, #tpu.memory_space<vmem>>, %arg8: memref<1x32xf32, #tpu.memory_space<vmem>>, %arg9: memref<1x32xf32, #tpu.memory_space<vmem>>, %arg10: memref<1x1xf32, #tpu.memory_space<smem>>, %arg11: memref<256x1xf32, #tpu.memory_space<vmem>>) attributes {dimension_semantics = [#tpu.dimension_semantics<parallel>], iteration_bounds = array<i64: 1>, scalar_prefetch = 0 : i64, scratch_operands = 0 : i64, tpu.core_type = #tpu.core_type<tc>, window_params = [{transform_indices = @transform_0, window_bounds = array<i64: 256, 64>}, {transform_indices = @transform_1, window_bounds = array<i64: 256, 64>}, {pipeline_mode = #tpu.pipeline_mode<synchronous>, transform_indices = @transform_2, window_bounds = array<i64: 32, 64>}, {pipeline_mode = #tpu.pipeline_mode<synchronous>, transform_indices = @transform_3, window_bounds = array<i64: 32, 64>}, {pipeline_mode = #tpu.pipeline_mode<synchronous>, transform_indices = @transform_4, window_bounds = array<i64: 1, 64>}, {pipeline_mode = #tpu.pipeline_mode<synchronous>, transform_indices = @transform_5, window_bounds = array<i64: 64, 32>}, {pipeline_mode = #tpu.pipeline_mode<synchronous>, transform_indices = @transform_6, window_bounds = array<i64: 1, 32>}, {pipeline_mode = #tpu.pipeline_mode<synchronous>, transform_indices = @transform_7, window_bounds = array<i64: 1, 32>}, {pipeline_mode = #tpu.pipeline_mode<synchronous>, transform_indices = @transform_8, window_bounds = array<i64: 1, 32>}, {transform_indices = @transform_9, window_bounds = array<i64: 1, 1>}, {transform_indices = @transform_10, window_bounds = array<i64: 256, 1>}]} {
    %c0 = arith.constant 0 : index
    %c0_0 = arith.constant 0 : index
    %0 = vector.load %arg1[%c0, %c0_0] : memref<256x64xbf16, #tpu.memory_space<vmem>>, vector<256x32xbf16>
    %c0_1 = arith.constant 0 : index
    %c32 = arith.constant 32 : index
    %1 = vector.load %arg1[%c0_1, %c32] : memref<256x64xbf16, #tpu.memory_space<vmem>>, vector<256x32xbf16>
    %c0_2 = arith.constant 0 : index
    %c0_3 = arith.constant 0 : index
    %2 = vector.load %arg2[%c0_2, %c0_3] : memref<256x64xbf16, #tpu.memory_space<vmem>>, vector<256x32xbf16>
    %c0_4 = arith.constant 0 : index
    %c32_5 = arith.constant 32 : index
    %3 = vector.load %arg2[%c0_4, %c32_5] : memref<256x64xbf16, #tpu.memory_space<vmem>>, vector<256x32xbf16>
    %4 = arith.extf %0 : vector<256x32xbf16> to vector<256x32xf32>
    %5 = arith.extf %2 : vector<256x32xbf16> to vector<256x32xf32>
    %6 = arith.mulf %4, %5 : vector<256x32xf32>
    %c0_6 = arith.constant 0 : index
    %c0_7 = arith.constant 0 : index
    %7 = vector.load %arg3[%c0_6, %c0_7] : memref<32x64xbf16, #tpu.memory_space<vmem>>, vector<32x64xbf16>
    %cst = arith.constant dense<0.000000e+00> : vector<256x64xf32>
    %8 = tpu.matmul %1, %7, %cst {dimension_numbers = #tpu.dot_dimension_numbers<[1], [0], [0], [1], [0, 0, 1, 1], [], []>} : vector<256x32xbf16>, vector<32x64xbf16>, vector<256x64xf32> -> vector<256x64xf32>
    %c0_8 = arith.constant 0 : index
    %c0_9 = arith.constant 0 : index
    %9 = vector.load %arg4[%c0_8, %c0_9] : memref<32x64xbf16, #tpu.memory_space<vmem>>, vector<32x64xbf16>
    %cst_10 = arith.constant dense<0.000000e+00> : vector<256x64xf32>
    %10 = tpu.matmul %3, %9, %cst_10 {dimension_numbers = #tpu.dot_dimension_numbers<[1], [0], [0], [1], [0, 0, 1, 1], [], []>} : vector<256x32xbf16>, vector<32x64xbf16>, vector<256x64xf32> -> vector<256x64xf32>
    %11 = arith.addf %8, %10 : vector<256x64xf32>
    %c0_11 = arith.constant 0 : index
    %c0_12 = arith.constant 0 : index
    %12 = vector.load %arg5[%c0_11, %c0_12] : memref<1x64xf32, #tpu.memory_space<vmem>>, vector<1x64xf32>
    %13 = vector.broadcast %12 : vector<1x64xf32> to vector<256x64xf32>
    %14 = arith.addf %11, %13 : vector<256x64xf32>
    %cst_13 = arith.constant 0.000000e+00 : f32
    %15 = vector.broadcast %cst_13 : f32 to vector<256x64xf32>
    %16 = arith.maximumf %14, %15 : vector<256x64xf32>
    %17 = arith.truncf %16 : vector<256x64xf32> to vector<256x64xbf16>
    %c0_14 = arith.constant 0 : index
    %c0_15 = arith.constant 0 : index
    %18 = vector.load %arg6[%c0_14, %c0_15] : memref<64x32xbf16, #tpu.memory_space<vmem>>, vector<64x32xbf16>
    %cst_16 = arith.constant dense<0.000000e+00> : vector<256x32xf32>
    %19 = tpu.matmul %17, %18, %cst_16 {dimension_numbers = #tpu.dot_dimension_numbers<[1], [0], [0], [1], [0, 0, 1, 1], [], []>} : vector<256x64xbf16>, vector<64x32xbf16>, vector<256x32xf32> -> vector<256x32xf32>
    %c0_17 = arith.constant 0 : index
    %c0_18 = arith.constant 0 : index
    %20 = vector.load %arg7[%c0_17, %c0_18] : memref<1x32xf32, #tpu.memory_space<vmem>>, vector<1x32xf32>
    %21 = vector.broadcast %20 : vector<1x32xf32> to vector<256x32xf32>
    %22 = arith.addf %19, %21 : vector<256x32xf32>
    %c0_19 = arith.constant 0 : index
    %c0_20 = arith.constant 0 : index
    %23 = vector.load %arg8[%c0_19, %c0_20] : memref<1x32xf32, #tpu.memory_space<vmem>>, vector<1x32xf32>
    %24 = vector.broadcast %23 : vector<1x32xf32> to vector<256x32xf32>
    %25 = arith.mulf %6, %24 : vector<256x32xf32>
    %cst_21 = arith.constant dense<0.000000e+00> : vector<256xf32>
    %26 = vector.multi_reduction <add>, %25, %cst_21 [1] : vector<256x32xf32> to vector<256xf32>
    %27 = vector.shape_cast %26 : vector<256xf32> to vector<256x1xf32>
    %c0_22 = arith.constant 0 : index
    %c0_23 = arith.constant 0 : index
    %28 = vector.load %arg9[%c0_22, %c0_23] : memref<1x32xf32, #tpu.memory_space<vmem>>, vector<1x32xf32>
    %29 = vector.broadcast %28 : vector<1x32xf32> to vector<256x32xf32>
    %30 = arith.mulf %22, %29 : vector<256x32xf32>
    %cst_24 = arith.constant dense<0.000000e+00> : vector<256xf32>
    %31 = vector.multi_reduction <add>, %30, %cst_24 [1] : vector<256x32xf32> to vector<256xf32>
    %32 = vector.shape_cast %31 : vector<256xf32> to vector<256x1xf32>
    %33 = arith.addf %27, %32 : vector<256x1xf32>
    %c0_25 = arith.constant 0 : index
    %c0_26 = arith.constant 0 : index
    %34 = memref.load %arg10[%c0_25, %c0_26] : memref<1x1xf32, #tpu.memory_space<smem>>
    %35 = vector.broadcast %34 : f32 to vector<256x1xf32>
    %36 = arith.addf %33, %35 : vector<256x1xf32>
    %37 = arith.negf %36 : vector<256x1xf32>
    %38 = math.exp %37 : vector<256x1xf32>
    %cst_27 = arith.constant 1.000000e+00 : f32
    %39 = vector.broadcast %cst_27 : f32 to vector<256x1xf32>
    %40 = arith.addf %39, %38 : vector<256x1xf32>
    %41 = arith.divf %39, %40 : vector<256x1xf32>
    %c0_28 = arith.constant 0 : index
    %c0_29 = arith.constant 0 : index
    %42 = vector.load %arg11[%c0_28, %c0_29] : memref<256x1xf32, #tpu.memory_space<vmem>>, vector<256x1xf32>
    tpu.vector_store %arg11[%c0_28, %c0_29], %41 {strides = array<i32>} : memref<256x1xf32, #tpu.memory_space<vmem>>, vector<256x1xf32>,
    return
  }
  func.func @transform_0(%arg0: i32) -> (i32, i32) {
    %c0_i32 = arith.constant 0 : i32
    %c0_i32_0 = arith.constant 0 : i32
    return %arg0, %c0_i32 : i32, i32
  }
  func.func @transform_1(%arg0: i32) -> (i32, i32) {
    %c0_i32 = arith.constant 0 : i32
    %c0_i32_0 = arith.constant 0 : i32
    return %arg0, %c0_i32 : i32, i32
  }
  func.func @transform_2(%arg0: i32) -> (i32, i32) {
    %c0_i32 = arith.constant 0 : i32
    %c0_i32_0 = arith.constant 0 : i32
    %c0_i32_1 = arith.constant 0 : i32
    return %c0_i32, %c0_i32_0 : i32, i32
  }
  func.func @transform_3(%arg0: i32) -> (i32, i32) {
    %c0_i32 = arith.constant 0 : i32
    %c0_i32_0 = arith.constant 0 : i32
    %c0_i32_1 = arith.constant 0 : i32
    return %c0_i32, %c0_i32_0 : i32, i32
  }
  func.func @transform_4(%arg0: i32) -> (i32, i32) {
    %c0_i32 = arith.constant 0 : i32
    %c0_i32_0 = arith.constant 0 : i32
    %c0_i32_1 = arith.constant 0 : i32
    return %c0_i32, %c0_i32_0 : i32, i32
  }
  func.func @transform_5(%arg0: i32) -> (i32, i32) {
    %c0_i32 = arith.constant 0 : i32
    %c0_i32_0 = arith.constant 0 : i32
    %c0_i32_1 = arith.constant 0 : i32
    return %c0_i32, %c0_i32_0 : i32, i32
  }
  func.func @transform_6(%arg0: i32) -> (i32, i32) {
    %c0_i32 = arith.constant 0 : i32
    %c0_i32_0 = arith.constant 0 : i32
    %c0_i32_1 = arith.constant 0 : i32
    return %c0_i32, %c0_i32_0 : i32, i32
  }
  func.func @transform_7(%arg0: i32) -> (i32, i32) {
    %c0_i32 = arith.constant 0 : i32
    %c0_i32_0 = arith.constant 0 : i32
    %c0_i32_1 = arith.constant 0 : i32
    return %c0_i32, %c0_i32_0 : i32, i32
  }
  func.func @transform_8(%arg0: i32) -> (i32, i32) {
    %c0_i32 = arith.constant 0 : i32
    %c0_i32_0 = arith.constant 0 : i32
    %c0_i32_1 = arith.constant 0 : i32
    return %c0_i32, %c0_i32_0 : i32, i32
  }
  func.func @transform_9(%arg0: i32) -> (i32, i32) {
    %c0_i32 = arith.constant 0 : i32
    %c0_i32_0 = arith.constant 0 : i32
    %c0_i32_1 = arith.constant 0 : i32
    return %c0_i32, %c0_i32_0 : i32, i32
  }
  func.func @transform_10(%arg0: i32) -> (i32, i32) {
    %c0_i32 = arith.constant 0 : i32
    %c0_i32_0 = arith.constant 0 : i32
    return %arg0, %c0_i32 : i32, i32
  }
}

</mosaic_0001>

<bundles_post_ra>
// kernel: tpu_custom_call.1
= control target key start
LH: loop header
LB: loop body
LE: loop exit
PB: predicated region body
PF: predicated region fallthrough
CT: control target
= control target key end

     0   :  { %s2385_s19 = smov 96   ;;  %vm329_vm0 = vcmask 261120   ;;  %vm848_vm1 = vcmask 523264   ;;  %vm1924_vm4 = vcmask 7168   ;;  %s3287_s1 = inlined_call_operand.vmem [shape: bf16[256,64], index: 1, kind: input, shape index: {}]   ;;  %s3288_s3 = inlined_call_operand.vmem [shape: bf16[32,64], index: 3, kind: input, shape index: {}]   ;;  %s3289_s0 = inlined_call_operand.vmem [shape: bf16[256,64], index: 0, kind: input, shape index: {}]   ;;  %s3290_s2 = inlined_call_operand.vmem [shape: bf16[32,64], index: 2, kind: input, shape index: {}]   ;;  %s3291_s4 = inlined_call_operand.vmem [shape: f32[1,64], index: 4, kind: input, shape index: {}]   ;;  %s3292_s7 = inlined_call_operand.vmem [shape: f32[1,32], index: 7, kind: input, shape index: {}]   ;;  %s3293_s5 = inlined_call_operand.vmem [shape: bf16[64,32], index: 5, kind: input, shape index: {}]   ;;  %s3294_s6 = inlined_call_operand.vmem [shape: f32[1,32], index: 6, kind: input, shape index: {}]   ;;  %s3295_s8 = inlined_call_operand.vmem [shape: f32[1,32], index: 8, kind: input, shape index: {}]   ;;  %s3296_s9 = inlined_call_operand.<no memory space> [shape: f32[1,1], index: 9, kind: input, shape index: {}]   ;;  %s3297_s10 = inlined_call_operand.vmem [shape: f32[256,1], index: 10, kind: output, shape index: {}]  }
   0x1   :  { %v2217_v0 = vld [vmem:[%s3287_s1] sm:$0xff]  ;;  %v2218_v1 = vld [vmem:[%s3287_s1 + $0x8] sm:$0xff]  ;;  %v2219_v2 = vld [vmem:[%s3287_s1 + $0x10] sm:$0xff] }
   0x2   :  { %285 = vrot.lane.b32.xlu0 %v2217_v0, %s2385_s19  ;;  %287 = vrot.lane.b32.xlu1 %v2218_v1, %s2385_s19  ;;  %v2236_v3 = vld [vmem:[%s3288_s3 + $0x8] sm:$0xff]  ;;  %v2201_v4 = vld [vmem:[%s3289_s0] sm:$0xff] }
   0x3   :  { %289 = vrot.lane.b32.xlu2 %v2219_v2, %s2385_s19  ;;  %v2202_v5 = vld [vmem:[%s3289_s0 + $0x8] sm:$0xff]  ;;  %v2203_v6 = vld [vmem:[%s3289_s0 + $0x10] sm:$0xff]  ;;  %384 = vmatpush.bf16.msra.mxu0 %v2236_v3  ;;  %v2235_v7 = vld [vmem:[%s3288_s3] sm:$0xff] }
   0x4   :  { %2241 = vmatpush.bf16.msra.mxu3 %v2236_v3  ;;  %v2220_v8 = vld [vmem:[%s3287_s1 + $0x18] sm:$0xff]  ;;  %v2221_v10 = vld [vmem:[%s3287_s1 + $0x20] sm:$0xff]  ;;  %v2222_v12 = vld [vmem:[%s3287_s1 + $0x28] sm:$0xff] }
   0x5   :  { %v2204_v9 = vld [vmem:[%s3289_s0 + $0x18] sm:$0xff]  ;;  %v2205_v11 = vld [vmem:[%s3289_s0 + $0x20] sm:$0xff]  ;;  %v2206_v13 = vld [vmem:[%s3289_s0 + $0x28] sm:$0xff] }
   0x6   :  { %v2223_v14 = vld [vmem:[%s3287_s1 + $0x30] sm:$0xff]  ;;  %v2224_v16 = vld [vmem:[%s3287_s1 + $0x38] sm:$0xff]  ;;  %v2234_v17 = vld [vmem:[%s3290_s2 + $0x8] sm:$0xff] }
   0x7   :  { %385 = vmatpush.bf16.msra.mxu0 %v2235_v7  ;;  %v2207_v15 = vld [vmem:[%s3289_s0 + $0x30] sm:$0xff]  ;;  %v2208_v18 = vld [vmem:[%s3289_s0 + $0x38] sm:$0xff]  ;;  %645 = vmatpush.bf16.msra.mxu1 %v2234_v17  ;;  %v2233_v19 = vld [vmem:[%s3290_s2] sm:$0xff] }
   0x8   :  { %2242 = vmatpush.bf16.msra.mxu3 %v2235_v7  ;;  %v2209_v20 = vld [vmem:[%s3289_s0 + $0x40] sm:$0xff]  ;;  %v2230_v22 = vld [vmem:[%s3287_s1 + $0x68] sm:$0xff]  ;;  %v2231_v24 = vld [vmem:[%s3287_s1 + $0x70] sm:$0xff] }
   0x9   :  { %v2225_v21 = vld [vmem:[%s3287_s1 + $0x40] sm:$0xff]  ;;  %v2226_v23 = vld [vmem:[%s3287_s1 + $0x48] sm:$0xff]  ;;  %v2227_v25 = vld [vmem:[%s3287_s1 + $0x50] sm:$0xff] }
   0xa   :  { %547 = vrot.lane.b32.xlu0 %v2201_v4, %s2385_s19  ;;  %549 = vrot.lane.b32.xlu1 %v2202_v5, %s2385_s19  ;;  %v2210_v27 = vld [vmem:[%s3289_s0 + $0x48] sm:$0xff]  ;;  %v2228_v28 = vld [vmem:[%s3287_s1 + $0x58] sm:$0xff] }
   0xb   :  { %551 = vrot.lane.b32.xlu2 %v2203_v6, %s2385_s19  ;;  %646 = vmatpush.bf16.msra.mxu1 %v2233_v19  ;;  %v2232_v30 = vld [vmem:[%s3287_s1 + $0x78] sm:$0xff]  ;;  %v2211_v31 = vld [vmem:[%s3289_s0 + $0x50] sm:$0xff]  ;;  %v2229_v32 = vld [vmem:[%s3287_s1 + $0x60] sm:$0xff] }
   0xc   :  { %2243 = vmatpush.bf16.msrb.mxu3 %v2234_v17  ;;  %v2212_v34 = vld [vmem:[%s3289_s0 + $0x58] sm:$0xff]  ;;  %v2215_v35 = vld [vmem:[%s3289_s0 + $0x70] sm:$0xff]  ;;  %v2214_v38 = vld [vmem:[%s3289_s0 + $0x68] sm:$0xff] }
   0xd   :  { %v2213_v39 = vld [vmem:[%s3289_s0 + $0x60] sm:$0xff]  ;;  %v2216_v41 = vld [vmem:[%s3289_s0 + $0x78] sm:$0xff]  ;;  %v2239_v58 = vld [vmem:[%s3293_s5 + $0x10] sm:$0xff] }
   0xe   :  { %v2240_v55 = vld [vmem:[%s3293_s5 + $0x18] sm:$0xff]  ;;  %v2238_v59 = vld [vmem:[%s3293_s5 + $0x8] sm:$0xff]  ;;  %v2237_v62 = vld [vmem:[%s3293_s5] sm:$0xff] }
   0xf   :  { %901 = vmatpush.bf16.msra.mxu2 %v2240_v55 }
  0x10   :  { %2244 = vmatpush.bf16.msrb.mxu3 %v2233_v19 }
  0x12   :  { %291 = vrot.lane.b32.xlu0 %v2220_v8, %s2385_s19  ;;  %553 = vrot.lane.b32.xlu1 %v2204_v9, %s2385_s19 }
  0x13   :  { %293 = vrot.lane.b32.xlu2 %v2221_v10, %s2385_s19  ;;  %902 = vmatpush.bf16.msra.mxu2 %v2239_v58  ;;  %v2624_v10 = vld [vmem:[%s3291_s4] ss:$0 sm:$0xff] }
  0x17   :  { %903 = vmatpush.bf16.msra.mxu2 %v2238_v59 }
  0x1a   :  { %555 = vrot.lane.b32.xlu0 %v2205_v11, %s2385_s19  ;;  %295 = vrot.lane.b32.xlu1 %v2222_v12, %s2385_s19 }
  0x1b   :  { %557 = vrot.lane.b32.xlu2 %v2206_v13, %s2385_s19  ;;  %904 = vmatpush.bf16.msra.mxu2 %v2237_v62 }
  0x22   :  { %297 = vrot.lane.b32.xlu0 %v2223_v14, %s2385_s19  ;;  %559 = vrot.lane.b32.xlu1 %v2207_v15, %s2385_s19 }
  0x23   :  { %299 = vrot.lane.b32.xlu2 %v2224_v16, %s2385_s19 }
  0x2a   :  { %561 = vrot.lane.b32.xlu0 %v2208_v18, %s2385_s19  ;;  %301 = vrot.lane.b32.xlu1 %v2225_v21, %s2385_s19 }
  0x2b   :  { %563 = vrot.lane.b32.xlu2 %v2209_v20, %s2385_s19 }
  0x32   :  { %303 = vrot.lane.b32.xlu0 %v2226_v23, %s2385_s19  ;;  %565 = vrot.lane.b32.xlu1 %v2210_v27, %s2385_s19 }
  0x33   :  { %311 = vrot.lane.b32.xlu2 %v2230_v22, %s2385_s19 }
  0x3a   :  { %305 = vrot.lane.b32.xlu0 %v2227_v25, %s2385_s19  ;;  %567 = vrot.lane.b32.xlu1 %v2211_v31, %s2385_s19 }
  0x3b   :  { %313 = vrot.lane.b32.xlu2 %v2231_v24, %s2385_s19 }
  0x42   :  { %307 = vrot.lane.b32.xlu0 %v2228_v28, %s2385_s19  ;;  %569 = vrot.lane.b32.xlu1 %v2212_v34, %s2385_s19  ;;  %v38_v34 = vld [vmem:[%s3289_s0 + $0x4] sm:$0xff]  }
  0x43   :  { %315 = vrot.lane.b32.xlu2 %v2232_v30, %s2385_s19 }
  0x4a   :  { %309 = vrot.lane.b32.xlu0 %v2229_v32, %s2385_s19  ;;  %571 = vrot.lane.b32.xlu1 %v2213_v39, %s2385_s19  ;;  %v69_v39 = vld [vmem:[%s3287_s1] sm:$0xf] }
  0x4b   :  { %573 = vrot.lane.b32.xlu2 %v2214_v38, %s2385_s19 }
  0x52   :  { %575 = vrot.lane.b32.xlu0 %v2215_v35, %s2385_s19  ;;  %577 = vrot.lane.b32.xlu1 %v2216_v41, %s2385_s19  ;;  %v70_v35 = vld [vmem:[%s3287_s1 + $0x4] sm:$0xff]   ;;  %v133_v41 = vunpack.c.l.bf16 %v69_v39 }
  0x53   :  { %v134_v38 = vunpack.c.l.bf16 %v70_v35 }
  0x5d   :  { %v290_v37 = vpop.permute.xlu2 %289 }
  0x65   :  { %v552_v40 = vpop.permute.xlu2 %551 }
  0x6d   :  { %v294_v42 = vpop.permute.xlu2 %293 }
  0x74   :  { %v286_v26 = vpop.permute.xlu0 %285  ;;  %v288_v33 = vpop.permute.xlu1 %287 }
  0x75   :  { %2033 = vmatmul.msk.bf16.vlgmr.msra.gmra.mxu0 %vm329_vm0, %v286_v26  ;;  %v558_v44 = vpop.permute.xlu2 %557 }
  0x7c   :  { %v548_v29 = vpop.permute.xlu0 %547  ;;  %v550_v36 = vpop.permute.xlu1 %549 }
  0x7d   :  { %2121 = vmatmul.msk.bf16.vlgmr.msra.gmra.mxu1 %vm329_vm0, %v548_v29  ;;  %v300_v46 = vpop.permute.xlu2 %299 }
  0x84   :  { %v292_v43 = vpop.permute.xlu0 %291  ;;  %v554_v45 = vpop.permute.xlu1 %553 }
  0x85   :  { %2034 = vmatmul.msk.bf16.gmra.mxu0 %vm329_vm0, %v288_v33  ;;  %v564_v47 = vpop.permute.xlu2 %563 }
  0x8c   :  { %v556_v48 = vpop.permute.xlu0 %555  ;;  %v296_v50 = vpop.permute.xlu1 %295 }
  0x8d   :  { %2122 = vmatmul.msk.bf16.gmra.mxu1 %vm329_vm0, %v550_v36  ;;  %v312_v49 = vpop.permute.xlu2 %311  ;;  %v37_v36 = vld [vmem:[%s3289_s0] sm:$0xf] }
  0x8e   :  { %2046 = vmatmul.msk.bf16.vlgmr.msra.gmra.mxu3 %vm329_vm0, %v312_v49 }
  0x8f   :  { %2245 = vmatpush.bf16.msra.mxu3 %v2240_v55  ;;  %v74_v55 = vld [vmem:[%s3287_s1 + $0x14] sm:$0xff]  }
  0x93   :  { %2246 = vmatpush.bf16.msra.mxu3 %v2239_v58  ;;  %v103_v58 = vunpack.c.h.bf16 %v38_v34 }
  0x94   :  { %v298_v52 = vpop.permute.xlu0 %297  ;;  %v560_v54 = vpop.permute.xlu1 %559 }
  0x95   :  { %2035 = vmatmul.msk.bf16.gmra.mxu0 %vm329_vm0, %v290_v37  ;;  %v314_v51 = vpop.permute.xlu2 %313  ;;  %v102_v37 = vunpack.c.l.bf16 %v38_v34 }
  0x97   :  { %2247 = vmatpush.bf16.msra.mxu3 %v2238_v59  ;;  %v135_v59 = vunpack.c.h.bf16 %v70_v35 }
  0x9b   :  { %2248 = vmatpush.bf16.msra.mxu3 %v2237_v62  ;;  %v138_v62 = vunpack.c.l.bf16 %v74_v55 }
  0x9c   :  { %v562_v53 = vpop.permute.xlu0 %561  ;;  %v302_v60 = vpop.permute.xlu1 %301 }
  0x9d   :  { %2123 = vmatmul.msk.bf16.gmra.mxu1 %vm329_vm0, %v552_v40  ;;  %v316_v56 = vpop.permute.xlu2 %315  ;;  %v101_v40 = vunpack.c.l.bf16 %v37_v36 }
  0x9e   :  { %2047 = vmatmul.msk.bf16.gmra.mxu3 %vm329_vm0, %v314_v51 }
  0xa4   :  { %v304_v57 = vpop.permute.xlu0 %303  ;;  %v566_v63 = vpop.permute.xlu1 %565 }
  0xa5   :  { %2036 = vmatmul.msk.bf16.gmra.mxu0 %vm329_vm0, %v292_v43  ;;  %v574_v0 = vpop.permute.xlu2 %573  ;;  %v166_v43 = vmul.f32 %v134_v38, %v102_v37 }
  0xac   :  { %v306_v61 = vpop.permute.xlu0 %305  ;;  %v568_v3 = vpop.permute.xlu1 %567 }
  0xad   :  { %2124 = vmatmul.msk.bf16.gmra.mxu1 %vm329_vm0, %v554_v45  ;;  %v165_v45 = vmul.f32 %v133_v41, %v101_v40  ;;  %v48_v40 = vld [vmem:[%s3289_s0 + $0x2c] sm:$0xff]  }
  0xae   :  { %2048 = vmatmul.msk.bf16.gmra.mxu3 %vm329_vm0, %v316_v56  ;;  %v40_v56 = vld [vmem:[%s3289_s0 + $0xc] sm:$0xff]  }
  0xaf   :  { %v80_v41 = vld [vmem:[%s3287_s1 + $0x2c] sm:$0xff]  }
  0xb4   :  { %v2612_v1 = vpop.permute.xlu0 %307  ;;  %v2619_v7 = vpop.permute.xlu1 %569 }
  0xb5   :  { %2037 = vmatmul.msk.bf16.gmra.mxu0 %vm329_vm0, %v294_v42 }
  0xbc   :  { %v2616_v4 = vpop.permute.xlu0 %309  ;;  %v2630_v16 = vpop.permute.xlu1 %571 }
  0xbd   :  { %2125 = vmatmul.msk.bf16.gmra.mxu1 %vm329_vm0, %v556_v48 }
  0xbe   :  { %2134 = vmatmul.msk.bf16.vlgmr.msrb.gmra.mxu3 %vm329_vm0, %v574_v0 }
  0xc4   :  { %v576_v8 = vpop.permute.xlu0 %575  ;;  %v578_v22 = vpop.permute.xlu1 %577 }
  0xc5   :  { %2038 = vmatmul.msk.bf16.gmra.mxu0 %vm329_vm0, %v296_v50 }
  0xcd   :  { %2126 = vmatmul.msk.bf16.gmra.mxu1 %vm329_vm0, %v558_v44  ;;  %v2655_v44 = vld [vmem:[%s3292_s7] ss:$0 sm:$0xff] }
  0xce   :  { %2135 = vmatmul.msk.bf16.gmra.mxu3 %vm329_vm0, %v576_v8  ;;  %v990_v49 = vmul.f32 %v2655_v44, %v165_v45 }
  0xd5   :  { %2039 = vmatmul.msk.bf16.gmra.mxu0 %vm329_vm0, %v298_v52 }
  0xdd   :  { %2127 = vmatmul.msk.bf16.gmra.mxu1 %vm329_vm0, %v560_v54  ;;  %v42_v54 = vld [vmem:[%s3289_s0 + $0x14] sm:$0xff]  }
  0xde   :  { %2136 = vmatmul.msk.bf16.gmra.mxu3 %vm329_vm0, %v578_v22  ;;  %v139_v22 = vunpack.c.h.bf16 %v74_v55 }
  0xe5   :  { %2040 = vmatmul.msk.bf16.gmra.mxu0 %vm329_vm0, %v300_v46  ;;  %v991_v46 = vmul.f32 %v2655_v44, %v166_v43 }
  0xe7   :  { %v1025_v52 = vsel %vm329_vm0, %v991_v46, 0.0 }
  0xe8   :  { %1026 = vadd.xlane.f32.xlu0 %v1025_v52 }
  0xed   :  { %2128 = vmatmul.msk.bf16.gmra.mxu1 %vm329_vm0, %v562_v53  ;;  %v1022_v53 = vsel %vm329_vm0, %v990_v49, 0.0  ;;  %v144_v49 = vunpack.c.l.bf16 %v80_v41 }
  0xee   :  { %1023 = vadd.xlane.f32.xlu2 %v1022_v53 }
  0xf2   :  { %v387_v2 = vpop.f32.mrf.mxu0 }
  0xf5   :  { %2041 = vmatmul.msk.bf16.gmra.mxu0 %vm329_vm0, %v302_v60  ;;  %v106_v60 = vunpack.c.l.bf16 %v42_v54 }
  0xfa   :  { %v389_v5 = vpop.f32.mrf.mxu0  ;;  %v648_v6 = vpop.f32.mrf.mxu1 }
  0xfb   :  { %v649_v9 = vadd.f32 %v648_v6, %v387_v2  ;;  %v170_v6 = vmul.f32 %v138_v62, %v106_v60 }
  0xfd   :  { %2129 = vmatmul.msk.bf16.gmra.mxu1 %vm329_vm0, %v564_v47  ;;  %v732_v13 = vadd.f32 %v2624_v10, %v649_v9 }
  0xff   :  { %v764_v17 = vmax.f32 %v732_v13, 0.0  ;;  %v995_v13 = vmul.f32 %v2655_v44, %v170_v6  ;;  %v113_v6 = vunpack.c.h.bf16 %v48_v40 }
 0x102   :  { %v392_v11 = vpop.f32.mrf.mxu0  ;;  %v650_v12 = vpop.f32.mrf.mxu1 }
 0x103   :  { %v651_v14 = vadd.f32 %v650_v12, %v389_v5  ;;  %v167_v5 = vmul.f32 %v135_v59, %v103_v58 }
 0x105   :  { %v733_v15 = vadd.f32 %v2624_v10, %v651_v14  ;;  %2042 = vmatmul.msk.bf16.gmra.mxu0 %vm329_vm0, %v304_v57 }
 0x107   :  { %v765_v18 = vmax.f32 %v733_v15, 0.0 }
 0x109   :  { %v796_v19 = vpack.c.bf16 %v765_v18, %v764_v17  ;;  %v1037_v17 = vsel %vm329_vm0, %v995_v13, 0.0 }
 0x10a   :  { %v394_v20 = vpop.f32.mrf.mxu0  ;;  %v653_v21 = vpop.f32.mrf.mxu1  ;;  %1038 = vadd.xlane.f32.xlu0 %v1037_v17 }
 0x10b   :  { %2153 = vmatmul.msk.bf16.vlgmr.msra.gmra.mxu2 %vm848_vm1, %v796_v19  ;;  %v654_v23 = vadd.f32 %v653_v21, %v392_v11  ;;  %v992_v11 = vmul.f32 %v2655_v44, %v167_v5  ;;  %v45_v19 = vld [vmem:[%s3289_s0 + $0x20] sm:$0xff]   ;;  %v107_v21 = vunpack.c.h.bf16 %v42_v54  ;;  %v47_v5 = vld [vmem:[%s3289_s0 + $0x28] sm:$0xf] }
 0x10c   :  { %v110_v45 = vunpack.c.h.bf16 %v45_v19 }
 0x10d   :  { %2130 = vmatmul.msk.bf16.gmra.mxu1 %vm329_vm0, %v566_v63  ;;  %v734_v26 = vadd.f32 %v2624_v10, %v654_v23  ;;  %v104_v63 = vunpack.c.l.bf16 %v40_v56  ;;  %v1028_v15 = vsel %vm329_vm0, %v992_v11, 0.0  ;;  %v109_v23 = vunpack.c.l.bf16 %v45_v19  ;;  %v79_v11 = vld [vmem:[%s3287_s1 + $0x28] sm:$0xf] }
 0x10e   :  { %1029 = vadd.xlane.f32.xlu1 %v1028_v15  ;;  %v143_v13 = vunpack.c.l.bf16 %v79_v11 }
 0x10f   :  { %v766_v29 = vmax.f32 %v734_v26, 0.0 }
 0x112   :  { %v397_v24 = vpop.f32.mrf.mxu0  ;;  %v655_v25 = vpop.f32.mrf.mxu1 }
 0x113   :  { %v656_v27 = vadd.f32 %v655_v25, %v394_v20  ;;  %v77_v20 = vld [vmem:[%s3287_s1 + $0x20] sm:$0xff]   ;;  %v105_v25 = vunpack.c.h.bf16 %v40_v56 }
 0x114   :  { %v142_v46 = vunpack.c.h.bf16 %v77_v20 }
 0x115   :  { %v735_v28 = vadd.f32 %v2624_v10, %v656_v27  ;;  %2043 = vmatmul.msk.bf16.gmra.mxu0 %vm329_vm0, %v306_v61  ;;  %v72_v61 = vld [vmem:[%s3287_s1 + $0xc] sm:$0xff]  }
 0x116   :  { %v136_v0 = vunpack.c.l.bf16 %v72_v61  ;;  %v137_v26 = vunpack.c.h.bf16 %v72_v61  ;;  %v174_v54 = vmul.f32 %v142_v46, %v110_v45 }
 0x117   :  { %v767_v30 = vmax.f32 %v735_v28, 0.0  ;;  %v171_v28 = vmul.f32 %v139_v22, %v107_v21 }
 0x118   :  { %v168_v8 = vmul.f32 %v136_v0, %v104_v63 }
 0x119   :  { %v797_v31 = vpack.c.bf16 %v767_v30, %v766_v29  ;;  %v169_v30 = vmul.f32 %v137_v26, %v105_v25 }
 0x11a   :  { %v399_v32 = vpop.f32.mrf.mxu0  ;;  %v658_v33 = vpop.f32.mrf.mxu1  ;;  %v993_v14 = vmul.f32 %v2655_v44, %v168_v8  ;;  %v145_v8 = vunpack.c.h.bf16 %v80_v41 }
 0x11b   :  { %2154 = vmatmul.msk.bf16.gmra.mxu2 %vm848_vm1, %v797_v31  ;;  %v659_v42 = vadd.f32 %v658_v33, %v397_v24  ;;  %v141_v24 = vunpack.c.l.bf16 %v77_v20  ;;  %v996_v31 = vmul.f32 %v2655_v44, %v171_v28  ;;  %v54_v28 = vld [vmem:[%s3289_s0 + $0x44] sm:$0xff]  }
 0x11c   :  { %v1031_v18 = vsel %vm329_vm0, %v993_v14, 0.0  ;;  %v177_v15 = vmul.f32 %v145_v8, %v113_v6 }
 0x11d   :  { %2131 = vmatmul.msk.bf16.gmra.mxu1 %vm329_vm0, %v568_v3  ;;  %v736_v50 = vadd.f32 %v2624_v10, %v659_v42  ;;  %1032 = vadd.xlane.f32.xlu2 %v1031_v18  ;;  %v173_v29 = vmul.f32 %v141_v24, %v109_v23  ;;  %v1040_v37 = vsel %vm329_vm0, %v996_v31, 0.0  ;;  %v44_v42 = vld [vmem:[%s3289_s0 + $0x1c] sm:$0xf] }
 0x11e   :  { %1041 = vadd.xlane.f32.xlu1 %v1040_v37  ;;  %v1002_v19 = vmul.f32 %v2655_v44, %v177_v15  ;;  %v60_v15 = vld [vmem:[%s3289_s0 + $0x5c] sm:$0xff]  }
 0x11f   :  { %v768_v2 = vmax.f32 %v736_v50, 0.0  ;;  %v998_v34 = vmul.f32 %v2655_v44, %v173_v29  ;;  %v108_v50 = vunpack.c.l.bf16 %v44_v42  ;;  %v86_v29 = vld [vmem:[%s3287_s1 + $0x44] sm:$0xff]  }
 0x120   :  { %v1058_v25 = vsel %vm329_vm0, %v1002_v19, 0.0 }
 0x121   :  { %v1046_v38 = vsel %vm329_vm0, %v998_v34, 0.0  ;;  %v118_v34 = vunpack.c.l.bf16 %v54_v28 }
 0x122   :  { %v402_v47 = vpop.f32.mrf.mxu0  ;;  %v660_v48 = vpop.f32.mrf.mxu1  ;;  %1047 = vadd.xlane.f32.xlu0 %v1046_v38 }
 0x123   :  { %v661_v51 = vadd.f32 %v660_v48, %v399_v32  ;;  %v76_v48 = vld [vmem:[%s3287_s1 + $0x1c] sm:$0xf] }
 0x125   :  { %v737_v57 = vadd.f32 %v2624_v10, %v661_v51  ;;  %2044 = vmatmul.msk.bf16.gmra.mxu0 %vm329_vm0, %v2612_v1  ;;  %v140_v51 = vunpack.c.l.bf16 %v76_v48 }
 0x127   :  { %v769_v3 = vmax.f32 %v737_v57, 0.0  ;;  %v172_v56 = vmul.f32 %v140_v51, %v108_v50 }
 0x129   :  { %v798_v9 = vpack.c.bf16 %v769_v3, %v768_v2  ;;  %v997_v61 = vmul.f32 %v2655_v44, %v172_v56  ;;  %v51_v2 = vld [vmem:[%s3289_s0 + $0x38] sm:$0xff]   ;;  %v119_v56 = vunpack.c.h.bf16 %v54_v28 }
 0x12a   :  { %v404_v1 = vpop.f32.mrf.mxu0  ;;  %v663_v12 = vpop.f32.mrf.mxu1  ;;  %v83_v3 = vld [vmem:[%s3287_s1 + $0x38] sm:$0xff]  }
 0x12b   :  { %2155 = vmatmul.msk.bf16.gmra.mxu2 %vm848_vm1, %v798_v9  ;;  %v664_v27 = vadd.f32 %v663_v12, %v402_v47  ;;  %v112_v47 = vunpack.c.l.bf16 %v48_v40  ;;  %v1043_v0 = vsel %vm329_vm0, %v997_v61, 0.0  ;;  %v115_v9 = vunpack.c.l.bf16 %v51_v2 }
 0x12c   :  { %v111_v12 = vunpack.c.l.bf16 %v47_v5 }
 0x12d   :  { %2132 = vmatmul.msk.bf16.gmra.mxu1 %vm329_vm0, %v2619_v7  ;;  %v994_v7 = vmul.f32 %v2655_v44, %v169_v30  ;;  %v738_v35 = vadd.f32 %v2624_v10, %v664_v27  ;;  %v176_v55 = vmul.f32 %v144_v49, %v112_v47  ;;  %v50_v30 = vld [vmem:[%s3289_s0 + $0x34] sm:$0xf] }
 0x12e   :  { %v175_v18 = vmul.f32 %v143_v13, %v111_v12 }
 0x12f   :  { %v1034_v39 = vsel %vm329_vm0, %v994_v7, 0.0  ;;  %v770_v52 = vmax.f32 %v738_v35, 0.0  ;;  %v1001_v60 = vmul.f32 %v2655_v44, %v176_v55  ;;  %v82_v7 = vld [vmem:[%s3287_s1 + $0x34] sm:$0xf]  ;;  %v150_v35 = vunpack.c.l.bf16 %v86_v29  ;;  %v53_v55 = vld [vmem:[%s3289_s0 + $0x40] sm:$0xf] }
 0x130   :  { %1035 = vadd.xlane.f32.xlu2 %v1034_v39  ;;  %v1000_v22 = vmul.f32 %v2655_v44, %v175_v18  ;;  %v146_v37 = vunpack.c.l.bf16 %v82_v7  ;;  %v56_v18 = vld [vmem:[%s3289_s0 + $0x4c] sm:$0xf] }
 0x131   :  { %v1055_v63 = vsel %vm329_vm0, %v1001_v60, 0.0  ;;  %v182_v41 = vmul.f32 %v150_v35, %v118_v34  ;;  %v117_v60 = vunpack.c.l.bf16 %v53_v55 }
 0x132   :  { %v407_v32 = vpop.f32.mrf.mxu0  ;;  %v665_v33 = vpop.f32.mrf.mxu1  ;;  %1056 = vadd.xlane.f32.xlu0 %v1055_v63  ;;  %v1052_v27 = vsel %vm329_vm0, %v1000_v22, 0.0  ;;  %v88_v22 = vld [vmem:[%s3287_s1 + $0x4c] sm:$0xf] }
 0x133   :  { %v666_v36 = vadd.f32 %v665_v33, %v404_v1  ;;  %v147_v1 = vunpack.c.l.bf16 %v83_v3  ;;  %v148_v33 = vunpack.c.h.bf16 %v83_v3  ;;  %v1007_v48 = vmul.f32 %v2655_v44, %v182_v41  ;;  %v59_v41 = vld [vmem:[%s3289_s0 + $0x58] sm:$0xf] }
 0x135   :  { %v739_v43 = vadd.f32 %v2624_v10, %v666_v36  ;;  %2045 = vmatmul.msk.bf16.gmra.mxu0 %vm329_vm0, %v2616_v4  ;;  %v999_v4 = vmul.f32 %v2655_v44, %v174_v54  ;;  %v179_v17 = vmul.f32 %v147_v1, %v115_v9  ;;  %v114_v36 = vunpack.c.l.bf16 %v50_v30  ;;  %v89_v54 = vld [vmem:[%s3287_s1 + $0x50] sm:$0xff]  }
 0x136   :  { %v1073_v51 = vsel %vm329_vm0, %v1007_v48, 0.0  ;;  %v123_v48 = vunpack.c.l.bf16 %v59_v41 }
 0x137   :  { %v771_v53 = vmax.f32 %v739_v43, 0.0  ;;  %v1049_v62 = vsel %vm329_vm0, %v999_v4, 0.0  ;;  %v1004_v21 = vmul.f32 %v2655_v44, %v179_v17  ;;  %v178_v42 = vmul.f32 %v146_v37, %v114_v36  ;;  %v92_v17 = vld [vmem:[%s3287_s1 + $0x5c] sm:$0xff]  }
 0x138   :  { %1050 = vadd.xlane.f32.xlu1 %v1049_v62  ;;  %1044 = vadd.xlane.f32.xlu2 %v1043_v0 }
 0x139   :  { %v799_v57 = vpack.c.bf16 %v771_v53, %v770_v52  ;;  %v1064_v26 = vsel %vm329_vm0, %v1004_v21, 0.0  ;;  %v1003_v49 = vmul.f32 %v2655_v44, %v178_v42  ;;  %v57_v53 = vld [vmem:[%s3289_s0 + $0x50] sm:$0xff]   ;;  %v124_v21 = vunpack.c.l.bf16 %v60_v15 }
 0x13a   :  { %v409_v58 = vpop.f32.mrf.mxu0  ;;  %v668_v59 = vpop.f32.mrf.mxu1  ;;  %1065 = vadd.xlane.f32.xlu0 %v1064_v26  ;;  %v121_v4 = vunpack.c.l.bf16 %v57_v53  ;;  %v125_v42 = vunpack.c.h.bf16 %v60_v15 }
 0x13b   :  { %2156 = vmatmul.msk.bf16.gmra.mxu2 %vm848_vm1, %v799_v57  ;;  %v669_v14 = vadd.f32 %v668_v59, %v407_v32  ;;  %v116_v32 = vunpack.c.h.bf16 %v51_v2  ;;  %v1061_v52 = vsel %vm329_vm0, %v1003_v49, 0.0  ;;  %v151_v57 = vunpack.c.h.bf16 %v86_v29 }
 0x13c   :  { %v153_v59 = vunpack.c.l.bf16 %v89_v54 }
 0x13d   :  { %2133 = vmatmul.msk.bf16.gmra.mxu1 %vm329_vm0, %v2630_v16  ;;  %v740_v23 = vadd.f32 %v2624_v10, %v669_v14  ;;  %v180_v40 = vmul.f32 %v148_v33, %v116_v32  ;;  %v183_v63 = vmul.f32 %v151_v57, %v119_v56 }
 0x13e   :  { %v185_v0 = vmul.f32 %v153_v59, %v121_v4 }
 0x13f   :  { %v772_v38 = vmax.f32 %v740_v23, 0.0  ;;  %v1005_v45 = vmul.f32 %v2655_v44, %v180_v40  ;;  %v1008_v3 = vmul.f32 %v2655_v44, %v183_v63  ;;  %v156_v23 = vunpack.c.l.bf16 %v92_v17  ;;  %v95_v40 = vld [vmem:[%s3287_s1 + $0x68] sm:$0xff]   ;;  %v66_v63 = vld [vmem:[%s3289_s0 + $0x74] sm:$0xf] }
 0x140   :  { %1059 = vadd.xlane.f32.xlu1 %v1058_v25  ;;  %1053 = vadd.xlane.f32.xlu2 %v1052_v27  ;;  %v1010_v8 = vmul.f32 %v2655_v44, %v185_v0  ;;  %v152_v25 = vunpack.c.l.bf16 %v88_v22  ;;  %v98_v0 = vld [vmem:[%s3287_s1 + $0x74] sm:$0xf] }
 0x141   :  { %v1067_v50 = vsel %vm329_vm0, %v1005_v45, 0.0  ;;  %v1076_v12 = vsel %vm329_vm0, %v1008_v3, 0.0  ;;  %v188_v29 = vmul.f32 %v156_v23, %v124_v21 }
 0x142   :  { %v412_v20 = vpop.f32.mrf.mxu0  ;;  %v670_v16 = vpop.f32.mrf.mxu1  ;;  %1074 = vadd.xlane.f32.xlu0 %v1073_v51  ;;  %v1082_v13 = vsel %vm329_vm0, %v1010_v8, 0.0  ;;  %v62_v8 = vld [vmem:[%s3289_s0 + $0x64] sm:$0xf] }
 0x143   :  { %v671_v24 = vadd.f32 %v670_v16, %v409_v58  ;;  %v85_v58 = vld [vmem:[%s3287_s1 + $0x40] sm:$0xf]  ;;  %v154_v16 = vunpack.c.h.bf16 %v89_v54  ;;  %v1013_v7 = vmul.f32 %v2655_v44, %v188_v29 }
 0x144   :  { %v149_v61 = vunpack.c.l.bf16 %v85_v58 }
 0x145   :  { %v741_v31 = vadd.f32 %v2624_v10, %v671_v24  ;;  %v120_v24 = vunpack.c.l.bf16 %v56_v18  ;;  %v1091_v37 = vsel %vm329_vm0, %v1013_v7, 0.0 }
 0x146   :  { %v181_v2 = vmul.f32 %v149_v61, %v117_v60 }
 0x147   :  { %v773_v39 = vmax.f32 %v741_v31, 0.0  ;;  %v184_v30 = vmul.f32 %v152_v25, %v120_v24 }
 0x148   :  { %1068 = vadd.xlane.f32.xlu1 %v1067_v50  ;;  %1062 = vadd.xlane.f32.xlu2 %v1061_v52  ;;  %v1006_v9 = vmul.f32 %v2655_v44, %v181_v2 }
 0x149   :  { %v800_v43 = vpack.c.bf16 %v773_v39, %v772_v38  ;;  %v1009_v35 = vmul.f32 %v2655_v44, %v184_v30  ;;  %v63_v39 = vld [vmem:[%s3289_s0 + $0x68] sm:$0xff]  }
 0x14a   :  { %v414_v46 = vpop.f32.mrf.mxu0  ;;  %v673_v47 = vpop.f32.mrf.mxu1  ;;  %v1070_v14 = vsel %vm329_vm0, %v1006_v9, 0.0  ;;  %1083 = vadd.xlane.f32.xlu0 %v1082_v13  ;;  %v127_v45 = vunpack.c.l.bf16 %v63_v39  ;;  %v128_v3 = vunpack.c.h.bf16 %v63_v39  ;;  %v94_v9 = vld [vmem:[%s3287_s1 + $0x64] sm:$0xf] }
 0x14b   :  { %2157 = vmatmul.msk.bf16.gmra.mxu2 %vm848_vm1, %v800_v43  ;;  %v674_v62 = vadd.f32 %v673_v47, %v412_v20  ;;  %v122_v20 = vunpack.c.h.bf16 %v57_v53  ;;  %v1079_v38 = vsel %vm329_vm0, %v1009_v35, 0.0  ;;  %v157_v43 = vunpack.c.h.bf16 %v92_v17 }
 0x14c   :  { %v159_v47 = vunpack.c.l.bf16 %v95_v40 }
 0x14d   :  { %v742_v11 = vadd.f32 %v2624_v10, %v674_v62  ;;  %v186_v28 = vmul.f32 %v154_v16, %v122_v20  ;;  %v189_v51 = vmul.f32 %v157_v43, %v125_v42 }
 0x14e   :  { %v191_v52 = vmul.f32 %v159_v47, %v127_v45  ;;  %v100_v47 = vld [vmem:[%s3287_s1 + $0x7c] sm:$0xf] }
 0x14f   :  { %v774_v26 = vmax.f32 %v742_v11, 0.0  ;;  %v1011_v32 = vmul.f32 %v2655_v44, %v186_v28  ;;  %v1014_v54 = vmul.f32 %v2655_v44, %v189_v51  ;;  %v162_v11 = vunpack.c.l.bf16 %v98_v0  ;;  %v99_v28 = vld [vmem:[%s3287_s1 + $0x78] sm:$0xf] }
 0x150   :  { %1077 = vadd.xlane.f32.xlu1 %v1076_v12  ;;  %1071 = vadd.xlane.f32.xlu2 %v1070_v14  ;;  %v1016_v57 = vmul.f32 %v2655_v44, %v191_v52  ;;  %v158_v12 = vunpack.c.l.bf16 %v94_v9  ;;  %v163_v30 = vunpack.c.l.bf16 %v99_v28  ;;  %v2877_v9 = vld [vmem:[%s3294_s6] ss:$0 sm:$0xff] }
 0x151   :  { %v1085_v36 = vsel %vm329_vm0, %v1011_v32, 0.0  ;;  %v1094_v60 = vsel %vm329_vm0, %v1014_v54, 0.0  ;;  %v97_v32 = vld [vmem:[%s3287_s1 + $0x70] sm:$0xf] }
 0x152   :  { %v417_v5 = vpop.f32.mrf.mxu0  ;;  %v675_v6 = vpop.f32.mrf.mxu1  ;;  %1092 = vadd.xlane.f32.xlu0 %v1091_v37  ;;  %v1100_v61 = vsel %vm329_vm0, %v1016_v57, 0.0 }
 0x153   :  { %v676_v1 = vadd.f32 %v675_v6, %v414_v46  ;;  %v91_v46 = vld [vmem:[%s3287_s1 + $0x58] sm:$0xf]  ;;  %v130_v6 = vunpack.c.l.bf16 %v66_v63 }
 0x154   :  { %v155_v49 = vunpack.c.l.bf16 %v91_v46  ;;  %v68_v46 = vld [vmem:[%s3289_s0 + $0x7c] sm:$0xf] }
 0x155   :  { %v743_v19 = vadd.f32 %v2624_v10, %v676_v1  ;;  %v126_v1 = vunpack.c.l.bf16 %v62_v8  ;;  %v194_v17 = vmul.f32 %v162_v11, %v130_v6  ;;  %v2882_v11 = vld [vmem:[%s3295_s8] ss:$0 sm:$0xff] }
 0x156   :  { %v187_v53 = vmul.f32 %v155_v49, %v123_v48  ;;  %v132_v49 = vunpack.c.l.bf16 %v68_v46 }
 0x157   :  { %v775_v27 = vmax.f32 %v743_v19, 0.0  ;;  %v190_v18 = vmul.f32 %v158_v12, %v126_v1  ;;  %v1019_v22 = vmul.f32 %v2655_v44, %v194_v17 }
 0x158   :  { %1086 = vadd.xlane.f32.xlu1 %v1085_v36  ;;  %1080 = vadd.xlane.f32.xlu2 %v1079_v38  ;;  %v1012_v4 = vmul.f32 %v2655_v44, %v187_v53 }
 0x159   :  { %v801_v31 = vpack.c.bf16 %v775_v27, %v774_v26  ;;  %v1015_v23 = vmul.f32 %v2655_v44, %v190_v18  ;;  %v1109_v25 = vsel %vm329_vm0, %v1019_v22, 0.0  ;;  %v67_v27 = vld [vmem:[%s3289_s0 + $0x78] sm:$0xf] }
 0x15a   :  { %v419_v33 = vpop.f32.mrf.mxu0  ;;  %v678_v34 = vpop.f32.mrf.mxu1  ;;  %v1088_v62 = vsel %vm329_vm0, %v1012_v4, 0.0  ;;  %1101 = vadd.xlane.f32.xlu0 %v1100_v61  ;;  %v131_v29 = vunpack.c.l.bf16 %v67_v27 }
 0x15b   :  { %2158 = vmatmul.msk.bf16.gmra.mxu2 %vm848_vm1, %v801_v31  ;;  %v679_v50 = vadd.f32 %v678_v34, %v417_v5  ;;  %v160_v5 = vunpack.c.h.bf16 %v95_v40  ;;  %v1097_v26 = vsel %vm329_vm0, %v1015_v23, 0.0  ;;  %v65_v31 = vld [vmem:[%s3289_s0 + $0x70] sm:$0xf]  ;;  %v161_v34 = vunpack.c.l.bf16 %v97_v32  ;;  %v2865_v4 = vpop.f32.mrf.mxu3 }
 0x15c   :  { %v195_v35 = vmul.f32 %v163_v30, %v131_v29 }
 0x15d   :  { %v744_v58 = vadd.f32 %v2624_v10, %v679_v50  ;;  %v192_v15 = vmul.f32 %v160_v5, %v128_v3  ;;  %v164_v50 = vunpack.c.l.bf16 %v100_v47 }
 0x15e   :  { %v1020_v37 = vmul.f32 %v2655_v44, %v195_v35 }
 0x15f   :  { %v776_v13 = vmax.f32 %v744_v58, 0.0  ;;  %v1017_v20 = vmul.f32 %v2655_v44, %v192_v15  ;;  %v196_v53 = vmul.f32 %v164_v50, %v132_v49 }
 0x160   :  { %1095 = vadd.xlane.f32.xlu1 %v1094_v60  ;;  %1089 = vadd.xlane.f32.xlu2 %v1088_v62  ;;  %v1112_v43 = vsel %vm329_vm0, %v1020_v37, 0.0 }
 0x161   :  { %v1103_v24 = vsel %vm329_vm0, %v1017_v20, 0.0 }
 0x162   :  { %v422_v55 = vpop.f32.mrf.mxu0  ;;  %v680_v56 = vpop.f32.mrf.mxu1  ;;  %1110 = vadd.xlane.f32.xlu0 %v1109_v25 }
 0x163   :  { %v681_v59 = vadd.f32 %v680_v56, %v419_v33  ;;  %v129_v33 = vunpack.c.l.bf16 %v65_v31  ;;  %v2870_v0 = vpop.f32.mrf.mxu3 }
 0x165   :  { %v745_v2 = vadd.f32 %v2624_v10, %v681_v59  ;;  %v193_v36 = vmul.f32 %v161_v34, %v129_v33 }
 0x167   :  { %v777_v14 = vmax.f32 %v745_v2, 0.0  ;;  %v1018_v40 = vmul.f32 %v2655_v44, %v193_v36 }
 0x168   :  { %1104 = vadd.xlane.f32.xlu1 %v1103_v24  ;;  %1098 = vadd.xlane.f32.xlu2 %v1097_v26 }
 0x169   :  { %v802_v19 = vpack.c.bf16 %v777_v14, %v776_v13  ;;  %v1106_v45 = vsel %vm329_vm0, %v1018_v40, 0.0 }
 0x16a   :  { %v424_v16 = vpop.f32.mrf.mxu0  ;;  %v683_v21 = vpop.f32.mrf.mxu1 }
 0x16b   :  { %2159 = vmatmul.msk.bf16.gmra.mxu2 %vm848_vm1, %v802_v19  ;;  %v684_v7 = vadd.f32 %v683_v21, %v422_v55  ;;  %v1021_v55 = vmul.f32 %v2655_v44, %v196_v53  ;;  %v2884_v12 = vpop.f32.mrf.mxu3 }
 0x16d   :  { %v746_v41 = vadd.f32 %v2624_v10, %v684_v7  ;;  %v1115_v58 = vsel %vm329_vm0, %v1021_v55, 0.0  ;;  %v2898_v7 = vpop.xlane.xlu2 %1023 }
 0x16f   :  { %v778_v51 = vmax.f32 %v746_v41, 0.0  ;;  %v2905_v41 = vpop.xlane.xlu0 %1026 }
 0x170   :  { %1113 = vadd.xlane.f32.xlu1 %v1112_v43  ;;  %1107 = vadd.xlane.f32.xlu2 %v1106_v45 }
 0x172   :  { %v427_v38 = vpop.f32.mrf.mxu0  ;;  %v685_v39 = vpop.f32.mrf.mxu1 }
 0x173   :  { %v686_v42 = vadd.f32 %v685_v39, %v424_v16  ;;  %v2892_v26 = vpop.f32.mrf.mxu3 }
 0x175   :  { %v747_v48 = vadd.f32 %v2624_v10, %v686_v42 }
 0x177   :  { %v779_v52 = vmax.f32 %v747_v48, 0.0 }
 0x178   :  { %1116 = vadd.xlane.f32.xlu2 %v1115_v58 }
 0x179   :  { %v803_v54 = vpack.c.bf16 %v779_v52, %v778_v51 }
 0x17a   :  { %v429_v56 = vpop.f32.mrf.mxu0  ;;  %v688_v57 = vpop.f32.mrf.mxu1 }
 0x17b   :  { %2160 = vmatmul.msk.bf16.gmra.mxu2 %vm848_vm1, %v803_v54  ;;  %v689_v59 = vadd.f32 %v688_v57, %v427_v38  ;;  %v2901_v37 = vpop.f32.mrf.mxu3 }
 0x17d   :  { %v748_v62 = vadd.f32 %v2624_v10, %v689_v59 }
 0x17f   :  { %v780_v44 = vmax.f32 %v748_v62, 0.0 }
 0x181   :  { %v2914_v54 = vpop.xlane.xlu1 %1029 }
 0x182   :  { %v432_v60 = vpop.f32.mrf.mxu0  ;;  %v690_v61 = vpop.f32.mrf.mxu1 }
 0x183   :  { %v691_v63 = vadd.f32 %v690_v61, %v429_v56  ;;  %v2916_v55 = vpop.f32.mrf.mxu3  ;;  %v2918_v56 = vpop.xlane.xlu0 %1038 }
 0x185   :  { %v749_v2 = vadd.f32 %v2624_v10, %v691_v63 }
 0x187   :  { %v781_v3 = vmax.f32 %v749_v2, 0.0 }
 0x189   :  { %v804_v5 = vpack.c.bf16 %v781_v3, %v780_v44 }
 0x18a   :  { %v434_v6 = vpop.f32.mrf.mxu0  ;;  %v693_v8 = vpop.f32.mrf.mxu1 }
 0x18b   :  { %2161 = vmatmul.msk.bf16.gmra.mxu2 %vm848_vm1, %v804_v5  ;;  %v694_v13 = vadd.f32 %v693_v8, %v432_v60 }
 0x18d   :  { %v750_v19 = vadd.f32 %v2624_v10, %v694_v13 }
 0x18e   :  { %v906_v1 = vpop.f32.mrf.mxu2 }
 0x18f   :  { %v907_v14 = vadd.f32 %v2877_v9, %v906_v1  ;;  %v782_v23 = vmax.f32 %v750_v19, 0.0  ;;  %v713_v1 = vpop.f32.mrf.mxu3 }
 0x190   :  { %v2910_v51 = vpop.xlane.xlu2 %1032 }
 0x191   :  { %v1122_v15 = vmul.f32 %v2882_v11, %v907_v14 }
 0x192   :  { %v437_v17 = vpop.f32.mrf.mxu0  ;;  %v695_v18 = vpop.f32.mrf.mxu1 }
 0x193   :  { %v696_v20 = vadd.f32 %v695_v18, %v434_v6  ;;  %v1154_v16 = vsel %vm329_vm0, %v1122_v15, 0.0  ;;  %v2927_v6 = vpop.xlane.xlu1 %1041 }
 0x194   :  { %1155 = vadd.xlane.f32.xlu0 %v1154_v16 }
 0x195   :  { %v751_v21 = vadd.f32 %v2624_v10, %v696_v20 }
 0x196   :  { %v908_v22 = vpop.f32.mrf.mxu2 }
 0x197   :  { %v783_v24 = vmax.f32 %v751_v21, 0.0  ;;  %v909_v25 = vadd.f32 %v2877_v9, %v908_v22 }
 0x199   :  { %v805_v27 = vpack.c.bf16 %v783_v24, %v782_v23  ;;  %v1123_v28 = vmul.f32 %v2882_v11, %v909_v25 }
 0x19a   :  { %v439_v29 = vpop.f32.mrf.mxu0  ;;  %v698_v30 = vpop.f32.mrf.mxu1 }
 0x19b   :  { %2162 = vmatmul.msk.bf16.gmra.mxu2 %vm848_vm1, %v805_v27  ;;  %v1157_v31 = vsel %vm329_vm0, %v1123_v28, 0.0  ;;  %v699_v33 = vadd.f32 %v698_v30, %v437_v17  ;;  %v2930_v17 = vpop.xlane.xlu0 %1047  ;;  %v715_v28 = vpop.f32.mrf.mxu3 }
 0x19c   :  { %1158 = vadd.xlane.f32.xlu1 %v1157_v31 }
 0x19d   :  { %v752_v38 = vadd.f32 %v2624_v10, %v699_v33 }
 0x19e   :  { %v911_v32 = vpop.f32.mrf.mxu2 }
 0x19f   :  { %v912_v34 = vadd.f32 %v2877_v9, %v911_v32  ;;  %v784_v46 = vmax.f32 %v752_v38, 0.0 }
 0x1a1   :  { %v1124_v35 = vmul.f32 %v2882_v11, %v912_v34 }
 0x1a2   :  { %v700_v36 = vpop.f32.mrf.mxu1  ;;  %v442_v42 = vpop.f32.mrf.mxu0 }
 0x1a3   :  { %v701_v39 = vadd.f32 %v700_v36, %v439_v29  ;;  %v1160_v40 = vsel %vm329_vm0, %v1124_v35, 0.0  ;;  %v2924_v3 = vpop.xlane.xlu2 %1035 }
 0x1a4   :  { %1161 = vadd.xlane.f32.xlu2 %v1160_v40 }
 0x1a5   :  { %v753_v43 = vadd.f32 %v2624_v10, %v701_v39  ;;  %v2941_v30 = vpop.xlane.xlu0 %1056 }
 0x1a6   :  { %v913_v45 = vpop.f32.mrf.mxu2 }
 0x1a7   :  { %v785_v47 = vmax.f32 %v753_v43, 0.0  ;;  %v914_v48 = vadd.f32 %v2877_v9, %v913_v45 }
 0x1a9   :  { %v806_v49 = vpack.c.bf16 %v785_v47, %v784_v46  ;;  %v1125_v50 = vmul.f32 %v2882_v11, %v914_v48 }
 0x1aa   :  { %v703_v52 = vpop.f32.mrf.mxu1  ;;  %v444_v57 = vpop.f32.mrf.mxu0 }
 0x1ab   :  { %2163 = vmatmul.msk.bf16.gmra.mxu2 %vm848_vm1, %v806_v49  ;;  %v1163_v53 = vsel %vm329_vm0, %v1125_v50, 0.0  ;;  %v704_v59 = vadd.f32 %v703_v52, %v442_v42  ;;  %v2935_v22 = vpop.xlane.xlu2 %1044  ;;  %v2938_v27 = vpop.xlane.xlu1 %1050  ;;  %v714_v52 = vadd.f32 %v713_v1, %v2865_v4 }
 0x1ac   :  { %1164 = vadd.xlane.f32.xlu0 %v1163_v53  ;;  %v718_v50 = vpop.f32.mrf.mxu3  ;;  %v716_v53 = vadd.f32 %v715_v28, %v2870_v0 }
 0x1ad   :  { %v754_v63 = vadd.f32 %v2624_v10, %v704_v59  ;;  %v2954_v49 = vpop.xlane.xlu0 %1065  ;;  %v758_v59 = vadd.f32 %v2624_v10, %v714_v52 }
 0x1ae   :  { %v916_v58 = vpop.f32.mrf.mxu2 }
 0x1af   :  { %v917_v60 = vadd.f32 %v2877_v9, %v916_v58  ;;  %v786_v13 = vmax.f32 %v754_v63, 0.0 }
 0x1b1   :  { %v1126_v61 = vmul.f32 %v2882_v11, %v917_v60  ;;  %v759_v60 = vadd.f32 %v2624_v10, %v716_v53  ;;  %v2382_v53 = vld [vmem:[%s3291_s4] ss:$0 sm:$0xff] }
 0x1b2   :  { %v705_v62 = vpop.f32.mrf.mxu1  ;;  %v447_v18 = vpop.f32.mrf.mxu0 }
 0x1b3   :  { %v706_v2 = vadd.f32 %v705_v62, %v444_v57  ;;  %v1166_v44 = vsel %vm329_vm0, %v1126_v61, 0.0  ;;  %v2947_v43 = vpop.xlane.xlu2 %1053  ;;  %v2950_v47 = vpop.xlane.xlu1 %1059  ;;  %v791_v4 = vmax.f32 %v759_v60, 0.0 }
 0x1b4   :  { %1167 = vadd.xlane.f32.xlu1 %v1166_v44  ;;  %v790_v44 = vmax.f32 %v758_v59, 0.0  ;;  %v720_v0 = vpop.f32.mrf.mxu3 }
 0x1b5   :  { %v755_v5 = vadd.f32 %v2624_v10, %v706_v2 }
 0x1b6   :  { %v918_v8 = vpop.f32.mrf.mxu2 }
 0x1b7   :  { %v787_v14 = vmax.f32 %v755_v5, 0.0  ;;  %v919_v15 = vadd.f32 %v2877_v9, %v918_v8  ;;  %v2967_v5 = vpop.xlane.xlu0 %1074 }
 0x1b9   :  { %v807_v19 = vpack.c.bf16 %v787_v14, %v786_v13  ;;  %v1127_v20 = vmul.f32 %v2882_v11, %v919_v15  ;;  %v809_v13 = vpack.c.bf16 %v791_v4, %v790_v44 }
 0x1ba   :  { %v708_v16 = vpop.f32.mrf.mxu1  ;;  %v449_v31 = vpop.f32.mrf.mxu0 }
 0x1bb   :  { %2164 = vmatmul.msk.bf16.gmra.mxu2 %vm848_vm1, %v807_v19  ;;  %v1169_v21 = vsel %vm329_vm0, %v1127_v20, 0.0  ;;  %v709_v24 = vadd.f32 %v708_v16, %v447_v18  ;;  %v2962_v62 = vpop.xlane.xlu2 %1062  ;;  %v2965_v2 = vpop.xlane.xlu1 %1068  ;;  %v719_v19 = vadd.f32 %v718_v50, %v2884_v12  ;;  %v721_v20 = vadd.f32 %v720_v0, %v2892_v26 }
 0x1bc   :  { %1170 = vadd.xlane.f32.xlu2 %v1169_v21 }
 0x1bd   :  { %v756_v33 = vadd.f32 %v2624_v10, %v709_v24  ;;  %v760_v28 = vadd.f32 %v2624_v10, %v719_v19 }
 0x1be   :  { %v921_v23 = vpop.f32.mrf.mxu2 }
 0x1bf   :  { %v922_v25 = vadd.f32 %v2877_v9, %v921_v23  ;;  %v788_v39 = vmax.f32 %v756_v33, 0.0  ;;  %v2980_v24 = vpop.xlane.xlu0 %1083  ;;  %v792_v12 = vmax.f32 %v760_v28, 0.0 }
 0x1c1   :  { %v1128_v29 = vmul.f32 %v2882_v11, %v922_v25  ;;  %v723_v25 = vpop.f32.mrf.mxu3 }
 0x1c2   :  { %v710_v32 = vpop.f32.mrf.mxu1 }
 0x1c3   :  { %v711_v34 = vadd.f32 %v710_v32, %v449_v31  ;;  %v1172_v35 = vsel %vm329_vm0, %v1128_v29, 0.0  ;;  %v2973_v18 = vpop.xlane.xlu2 %1071  ;;  %v2977_v16 = vpop.xlane.xlu1 %1077  ;;  %v761_v29 = vadd.f32 %v2624_v10, %v721_v20 }
 0x1c4   :  { %1173 = vadd.xlane.f32.xlu0 %v1172_v35 }
 0x1c5   :  { %v757_v36 = vadd.f32 %v2624_v10, %v711_v34  ;;  %v793_v33 = vmax.f32 %v761_v29, 0.0 }
 0x1c6   :  { %v923_v38 = vpop.f32.mrf.mxu2 }
 0x1c7   :  { %v789_v40 = vmax.f32 %v757_v36, 0.0  ;;  %v924_v42 = vadd.f32 %v2877_v9, %v923_v38  ;;  %v810_v38 = vpack.c.bf16 %v793_v33, %v792_v12 }
 0x1c9   :  { %v808_v45 = vpack.c.bf16 %v789_v40, %v788_v39  ;;  %v1129_v46 = vmul.f32 %v2882_v11, %v924_v42  ;;  %v2992_v40 = vpop.xlane.xlu0 %1092  ;;  %v725_v10 = vpop.f32.mrf.mxu3 }
 0x1cb   :  { %2165 = vmatmul.msk.bf16.vlgmr.msra.gmra.mxu3 %vm848_vm1, %v808_v45  ;;  %v1175_v48 = vsel %vm329_vm0, %v1129_v46, 0.0  ;;  %v2986_v26 = vpop.xlane.xlu2 %1080  ;;  %v2989_v36 = vpop.xlane.xlu1 %1086  ;;  %v724_v45 = vadd.f32 %v723_v25, %v2901_v37  ;;  %v726_v46 = vadd.f32 %v725_v10, %v2916_v55 }
 0x1cc   :  { %1176 = vadd.xlane.f32.xlu1 %v1175_v48 }
 0x1ce   :  { %v926_v57 = vpop.f32.mrf.mxu2 }
 0x1cf   :  { %v927_v58 = vadd.f32 %v2877_v9, %v926_v57  ;;  %v762_v57 = vadd.f32 %v2382_v53, %v724_v45 }
 0x1d1   :  { %v1130_v61 = vmul.f32 %v2882_v11, %v927_v58  ;;  %v763_v58 = vadd.f32 %v2382_v53, %v726_v46  ;;  %v3008_v37 = vpop.xlane.xlu0 %1101  ;;  %v794_v55 = vmax.f32 %v762_v57, 0.0 }
 0x1d3   :  { %v1178_v63 = vsel %vm329_vm0, %v1130_v61, 0.0  ;;  %v2999_v52 = vpop.xlane.xlu2 %1089  ;;  %v3005_v60 = vpop.xlane.xlu1 %1095 }
 0x1d4   :  { %1179 = vadd.xlane.f32.xlu2 %v1178_v63  ;;  %v795_v63 = vmax.f32 %v763_v58, 0.0 }
 0x1d6   :  { %v928_v8 = vpop.f32.mrf.mxu2  ;;  %v811_v0 = vpack.c.bf16 %v795_v63, %v794_v55 }
 0x1d7   :  { %v929_v1 = vadd.f32 %v2877_v9, %v928_v8 }
 0x1d9   :  { %v1131_v14 = vmul.f32 %v2882_v11, %v929_v1 }
 0x1db   :  { %2166 = vmatmul.msk.bf16.gmra.mxu3 %vm848_vm1, %v809_v13  ;;  %v1181_v15 = vsel %vm329_vm0, %v1131_v14, 0.0  ;;  %v3012_v1 = vpop.xlane.xlu2 %1098  ;;  %v3016_v14 = vpop.xlane.xlu1 %1104 }
 0x1dc   :  { %1182 = vadd.xlane.f32.xlu0 %v1181_v15  ;;  %v3018_v15 = vpop.xlane.xlu0 %1110 }
 0x1de   :  { %v931_v21 = vpop.f32.mrf.mxu2 }
 0x1df   :  { %v932_v23 = vadd.f32 %v2877_v9, %v931_v21 }
 0x1e1   :  { %v1132_v31 = vmul.f32 %v2882_v11, %v932_v23 }
 0x1e3   :  { %v1184_v32 = vsel %vm329_vm0, %v1132_v31, 0.0  ;;  %v3023_v25 = vpop.xlane.xlu2 %1107  ;;  %v3025_v28 = vpop.xlane.xlu1 %1113 }
 0x1e4   :  { %1185 = vadd.xlane.f32.xlu1 %v1184_v32  ;;  %v3031_v32 = vstv %s3296_s9 }
 0x1e6   :  { %v933_v34 = vpop.f32.mrf.mxu2 }
 0x1e7   :  { %v934_v35 = vadd.f32 %v2877_v9, %v933_v34 }
 0x1e9   :  { %v1133_v39 = vmul.f32 %v2882_v11, %v934_v35 }
 0x1eb   :  { %2167 = vmatmul.msk.bf16.gmra.mxu3 %vm848_vm1, %v810_v38  ;;  %v1187_v42 = vsel %vm329_vm0, %v1133_v39, 0.0  ;;  %v3037_v10 = vpop.xlane.xlu2 %1116 }
 0x1ec   :  { %1188 = vadd.xlane.f32.xlu2 %v1187_v42 }
 0x1ee   :  { %v936_v48 = vpop.f32.mrf.mxu2 }
 0x1ef   :  { %v937_v50 = vadd.f32 %v2877_v9, %v936_v48 }
 0x1f1   :  { %v1134_v59 = vmul.f32 %v2882_v11, %v937_v50 }
 0x1f3   :  { %v1190_v61 = vsel %vm329_vm0, %v1134_v59, 0.0 }
 0x1f4   :  { %1191 = vadd.xlane.f32.xlu0 %v1190_v61 }
 0x1f6   :  { %v938_v44 = vpop.f32.mrf.mxu2 }
 0x1f7   :  { %v939_v4 = vadd.f32 %v2877_v9, %v938_v44 }
 0x1f9   :  { %v1135_v8 = vmul.f32 %v2882_v11, %v939_v4 }
 0x1fb   :  { %2168 = vmatmul.msk.bf16.gmra.mxu3 %vm848_vm1, %v811_v0  ;;  %v1193_v13 = vsel %vm329_vm0, %v1135_v8, 0.0 }
 0x1fc   :  { %1194 = vadd.xlane.f32.xlu1 %v1193_v13 }
 0x1fe   :  { %v941_v19 = vpop.f32.mrf.mxu2 }
 0x1ff   :  { %v942_v20 = vadd.f32 %v2877_v9, %v941_v19 }
 0x201   :  { %v1136_v21 = vmul.f32 %v2882_v11, %v942_v20 }
 0x203   :  { %v1196_v23 = vsel %vm329_vm0, %v1136_v21, 0.0 }
 0x204   :  { %1197 = vadd.xlane.f32.xlu2 %v1196_v23 }
 0x206   :  { %v943_v29 = vpop.f32.mrf.mxu2 }
 0x207   :  { %v944_v31 = vadd.f32 %v2877_v9, %v943_v29  ;;  %v1156_v12 = vpop.xlane.xlu0 %1155 }
 0x208   :  { %v1250_v33 = vadd.f32 %v1156_v12, %v2898_v7 }
 0x209   :  { %v1137_v34 = vmul.f32 %v2882_v11, %v944_v31 }
 0x20a   :  { %v1284_v35 = vadd.f32 %v3031_v32, %v1250_v33 }
 0x20b   :  { %v1199_v38 = vsel %vm329_vm0, %v1137_v34, 0.0 }
 0x20c   :  { %v2169_v39 = vmul.f32 -1.442695, %v1284_v35  ;;  %1200 = vadd.xlane.f32.xlu0 %v1199_v38 }
 0x20e   :  { %2254 = vpow2.f32 %v2169_v39  ;;  %v946_v42 = vpop.f32.mrf.mxu2 }
 0x20f   :  { %v947_v45 = vadd.f32 %v2877_v9, %v946_v42  ;;  %v1159_v46 = vpop.xlane.xlu1 %1158 }
 0x210   :  { %v1251_v48 = vadd.f32 %v1159_v46, %v2905_v41 }
 0x211   :  { %v1138_v50 = vmul.f32 %v2882_v11, %v947_v45 }
 0x212   :  { %v1285_v7 = vadd.f32 %v3031_v32, %v1251_v48 }
 0x213   :  { %v1202_v53 = vsel %vm329_vm0, %v1138_v50, 0.0 }
 0x214   :  { %v2255_v57 = vpop.eup %2254  ;;  %v2170_v58 = vmul.f32 -1.442695, %v1285_v7  ;;  %1203 = vadd.xlane.f32.xlu1 %v1202_v53 }
 0x215   :  { %v1412_v59 = vadd.f32 1.0, %v2255_v57 }
 0x216   :  { %2256 = vpow2.f32 %v2170_v58  ;;  %v948_v61 = vpop.f32.mrf.mxu2 }
 0x217   :  { %2258 = vrcp.f32 %v1412_v59  ;;  %v1162_v55 = vpop.xlane.xlu2 %1161  ;;  %v949_v63 = vadd.f32 %v2877_v9, %v948_v61  ;;  %v1453_v33 = vand.u32 2147483647, %v1412_v59  ;;  %v1455_v34 = vand.u32 2147483648, %v1412_v59 }
 0x218   :  { %v1252_v44 = vadd.f32 %v1162_v55, %v2914_v54  ;;  %vm1449_vm3 = vweird.f32 %v1412_v59 }
 0x219   :  { %v1139_v4 = vmul.f32 %v2882_v11, %v949_v63  ;;  %v1456_v7 = vor.u32 1.1754944e-38, %v1455_v34  ;;  %vm1454_vm6 = vcmp.eq.f32.partialorder %v1453_v33, 8.507059e+37 }
 0x21a   :  { %v1286_v41 = vadd.f32 %v3031_v32, %v1252_v44 }
 0x21b   :  { %v1205_v13 = vsel %vm329_vm0, %v1139_v4, 0.0 }
 0x21c   :  { %v2257_v0 = vpop.eup %2256  ;;  %v2171_v8 = vmul.f32 -1.442695, %v1286_v41  ;;  %1206 = vadd.xlane.f32.xlu2 %v1205_v13 }
 0x21d   :  { %v2259_v19 = vpop.eup %2258  ;;  %v1413_v20 = vadd.f32 1.0, %v2257_v0 }
 0x21e   :  { %v1445_v21 = vmul.f32 %v2259_v19, %v1412_v59  ;;  %2260 = vpow2.f32 %v2171_v8  ;;  %v951_v23 = vpop.f32.mrf.mxu2  ;;  %vm1450_vm2 = vweird.f32 %v2259_v19 }
 0x21f   :  { %2262 = vrcp.f32 %v1413_v20  ;;  %v1165_v29 = vpop.xlane.xlu0 %1164  ;;  %v952_v12 = vadd.f32 %v2877_v9, %v951_v23  ;;  %vm1451_vm5 = vmor %vm1449_vm3, %vm1450_vm2  ;;  %v1468_v41 = vand.u32 2147483647, %v1413_v20  ;;  %v1470_v4 = vand.u32 2147483648, %v1413_v20 }
 0x220   :  { %v1446_v31 = vsub.f32 1.0, %v1445_v21  ;;  %v1253_v54 = vadd.f32 %v1165_v29, %v2910_v51  ;;  %vm1464_vm8 = vweird.f32 %v1413_v20 }
 0x221   :  { %v1140_v39 = vmul.f32 %v2882_v11, %v952_v12  ;;  %v1471_v12 = vor.u32 1.1754944e-38, %v1470_v4  ;;  %vm1469_vm10 = vcmp.eq.f32.partialorder %v1468_v41, 8.507059e+37 }
 0x222   :  { %v1447_v35 = vmul.f32 %v2259_v19, %v1446_v31  ;;  %v1287_v38 = vadd.f32 %v3031_v32, %v1253_v54 }
 0x223   :  { %v1208_v48 = vsel %vm329_vm0, %v1140_v39, 0.0 }
 0x224   :  { %v2261_v42 = vpop.eup %2260  ;;  %v1448_v45 = vadd.f32 %v2259_v19, %v1447_v35  ;;  %v2172_v46 = vmul.f32 -1.442695, %v1287_v38  ;;  %1209 = vadd.xlane.f32.xlu0 %v1208_v48 }
 0x225   :  { %v2263_v50 = vpop.eup %2262  ;;  %v1414_v53 = vadd.f32 1.0, %v2261_v42 }
 0x226   :  { %v1452_v51 = vsel %vm1451_vm5, %v2259_v19, %v1448_v45  ;;  %v1460_v57 = vmul.f32 %v2263_v50, %v1413_v20  ;;  %2264 = vpow2.f32 %v2172_v46  ;;  %v953_v58 = vpop.f32.mrf.mxu2  ;;  %vm1465_vm7 = vweird.f32 %v2263_v50 }
 0x227   :  { %v1457_v61 = vsel %vm1454_vm6, %v1456_v7, %v1452_v51  ;;  %2266 = vrcp.f32 %v1414_v53  ;;  %v1168_v55 = vpop.xlane.xlu1 %1167  ;;  %v954_v63 = vadd.f32 %v2877_v9, %v953_v58  ;;  %vm1466_vm9 = vmor %vm1464_vm8, %vm1465_vm7  ;;  %v1483_v45 = vand.u32 2147483647, %v1414_v53 }
 0x228   :  { %1925 = vst.msk [vmem:[%s3297_s10] sm:$0xff] %vm1924_vm4, %v1457_v61  ;;  %v1461_v59 = vsub.f32 1.0, %v1460_v57  ;;  %v1254_v44 = vadd.f32 %v1168_v55, %v2924_v3  ;;  %v1485_v46 = vand.u32 2147483648, %v1414_v53  ;;  %vm1479_vm12 = vweird.f32 %v1414_v53 }
 0x229   :  { %v1141_v13 = vmul.f32 %v2882_v11, %v954_v63  ;;  %vm1484_vm14 = vcmp.eq.f32.partialorder %v1483_v45, 8.507059e+37 }
 0x22a   :  { %v1462_v0 = vmul.f32 %v2263_v50, %v1461_v59  ;;  %v1288_v8 = vadd.f32 %v3031_v32, %v1254_v44  ;;  %v1486_v59 = vor.u32 1.1754944e-38, %v1485_v46 }
 0x22b   :  { %v1211_v29 = vsel %vm329_vm0, %v1141_v13, 0.0 }
 0x22c   :  { %v2265_v19 = vpop.eup %2264  ;;  %v1463_v21 = vadd.f32 %v2263_v50, %v1462_v0  ;;  %v2173_v23 = vmul.f32 -1.442695, %v1288_v8  ;;  %1212 = vadd.xlane.f32.xlu1 %v1211_v29 }
 0x22d   :  { %v2267_v31 = vpop.eup %2266  ;;  %v1415_v54 = vadd.f32 1.0, %v2265_v19 }
 0x22e   :  { %v1467_v3 = vsel %vm1466_vm9, %v2263_v50, %v1463_v21  ;;  %v1475_v33 = vmul.f32 %v2267_v31, %v1414_v53  ;;  %2268 = vpow2.f32 %v2173_v23  ;;  %v956_v34 = vpop.f32.mrf.mxu2  ;;  %vm1480_vm11 = vweird.f32 %v2267_v31 }
 0x22f   :  { %v1472_v35 = vsel %vm1469_vm10, %v1471_v12, %v1467_v3  ;;  %2270 = vrcp.f32 %v1415_v54  ;;  %v1171_v38 = vpop.xlane.xlu2 %1170  ;;  %v957_v39 = vadd.f32 %v2877_v9, %v956_v34  ;;  %vm1481_vm13 = vmor %vm1479_vm12, %vm1480_vm11  ;;  %v1498_v19 = vand.u32 2147483647, %v1415_v54 }
 0x230   :  { %1926 = vst.msk [vmem:[%s3297_s10 + $0x8] sm:$0xff] %vm1924_vm4, %v1472_v35  ;;  %v1476_v20 = vsub.f32 1.0, %v1475_v33  ;;  %v1255_v42 = vadd.f32 %v1171_v38, %v2918_v56  ;;  %v1500_v21 = vand.u32 2147483648, %v1415_v54  ;;  %vm1494_vm1 = vweird.f32 %v1415_v54 }
 0x231   :  { %v1142_v7 = vmul.f32 %v2882_v11, %v957_v39  ;;  %vm1499_vm3 = vcmp.eq.f32.partialorder %v1498_v19, 8.507059e+37 }
 0x232   :  { %v1477_v48 = vmul.f32 %v2267_v31, %v1476_v20  ;;  %v1289_v50 = vadd.f32 %v3031_v32, %v1255_v42  ;;  %v1501_v38 = vor.u32 1.1754944e-38, %v1500_v21 }
 0x233   :  { %v1214_v61 = vsel %vm329_vm0, %v1142_v7, 0.0 }
 0x234   :  { %v2269_v51 = vpop.eup %2268  ;;  %v1478_v57 = vadd.f32 %v2267_v31, %v1477_v48  ;;  %v2174_v58 = vmul.f32 -1.442695, %v1289_v50  ;;  %1215 = vadd.xlane.f32.xlu2 %v1214_v61 }
 0x235   :  { %v2271_v55 = vpop.eup %2270  ;;  %v1416_v63 = vadd.f32 1.0, %v2269_v51 }
 0x236   :  { %v1482_v56 = vsel %vm1481_vm13, %v2267_v31, %v1478_v57  ;;  %v1490_v44 = vmul.f32 %v2271_v55, %v1415_v54  ;;  %2272 = vpow2.f32 %v2174_v58  ;;  %v958_v41 = vpop.f32.mrf.mxu2  ;;  %vm1495_vm15 = vweird.f32 %v2271_v55 }
 0x237   :  { %v1487_v4 = vsel %vm1484_vm14, %v1486_v59, %v1482_v56  ;;  %2274 = vrcp.f32 %v1416_v63  ;;  %v1174_v0 = vpop.xlane.xlu0 %1173  ;;  %v959_v8 = vadd.f32 %v2877_v9, %v958_v41  ;;  %vm1496_vm2 = vmor %vm1494_vm1, %vm1495_vm15  ;;  %v1513_v7 = vand.u32 2147483647, %v1416_v63 }
 0x238   :  { %1927 = vst.msk [vmem:[%s3297_s10 + $0x10] sm:$0xff] %vm1924_vm4, %v1487_v4  ;;  %v1491_v53 = vsub.f32 1.0, %v1490_v44  ;;  %v1256_v13 = vadd.f32 %v1174_v0, %v2927_v6  ;;  %v1515_v51 = vand.u32 2147483648, %v1416_v63  ;;  %vm1509_vm6 = vweird.f32 %v1416_v63 }
 0x239   :  { %v1143_v31 = vmul.f32 %v2882_v11, %v959_v8  ;;  %vm1514_vm8 = vcmp.eq.f32.partialorder %v1513_v7, 8.507059e+37 }
 0x23a   :  { %v1492_v23 = vmul.f32 %v2271_v55, %v1491_v53  ;;  %v1290_v29 = vadd.f32 %v3031_v32, %v1256_v13  ;;  %v1516_v4 = vor.u32 1.1754944e-38, %v1515_v51 }
 0x23b   :  { %v1217_v34 = vsel %vm329_vm0, %v1143_v31, 0.0 }
 0x23c   :  { %v2273_v12 = vpop.eup %2272  ;;  %v1493_v3 = vadd.f32 %v2271_v55, %v1492_v23  ;;  %v2175_v33 = vmul.f32 -1.442695, %v1290_v29  ;;  %1218 = vadd.xlane.f32.xlu0 %v1217_v34 }
 0x23d   :  { %v2275_v35 = vpop.eup %2274  ;;  %v1417_v20 = vadd.f32 1.0, %v2273_v12 }
 0x23e   :  { %v1497_v6 = vsel %vm1496_vm2, %v2271_v55, %v1493_v3  ;;  %v1505_v39 = vmul.f32 %v2275_v35, %v1416_v63  ;;  %2276 = vpow2.f32 %v2175_v33  ;;  %v961_v42 = vpop.f32.mrf.mxu2  ;;  %vm1510_vm5 = vweird.f32 %v2275_v35 }
 0x23f   :  { %v1502_v45 = vsel %vm1499_vm3, %v1501_v38, %v1497_v6  ;;  %2278 = vrcp.f32 %v1417_v20  ;;  %v1177_v46 = vpop.xlane.xlu1 %1176  ;;  %v962_v48 = vadd.f32 %v2877_v9, %v961_v42  ;;  %vm1511_vm7 = vmor %vm1509_vm6, %vm1510_vm5  ;;  %v1528_v29 = vand.u32 2147483647, %v1417_v20 }
 0x240   :  { %1928 = vst.msk [vmem:[%s3297_s10 + $0x18] sm:$0xff] %vm1924_vm4, %v1502_v45  ;;  %v1506_v54 = vsub.f32 1.0, %v1505_v39  ;;  %v1257_v50 = vadd.f32 %v1177_v46, %v2935_v22  ;;  %v1530_v31 = vand.u32 2147483648, %v1417_v20  ;;  %vm1524_vm10 = vweird.f32 %v1417_v20 }
 0x241   :  { %v1144_v61 = vmul.f32 %v2882_v11, %v962_v48  ;;  %vm1529_vm12 = vcmp.eq.f32.partialorder %v1528_v29, 8.507059e+37 }
 0x242   :  { %v1507_v57 = vmul.f32 %v2275_v35, %v1506_v54  ;;  %v1291_v58 = vadd.f32 %v3031_v32, %v1257_v50  ;;  %v1531_v42 = vor.u32 1.1754944e-38, %v1530_v31 }
 0x243   :  { %v1220_v44 = vsel %vm329_vm0, %v1144_v61, 0.0 }
 0x244   :  { %v2277_v55 = vpop.eup %2276  ;;  %v1508_v59 = vadd.f32 %v2275_v35, %v1507_v57  ;;  %v2176_v56 = vmul.f32 -1.442695, %v1291_v58  ;;  %1221 = vadd.xlane.f32.xlu1 %v1220_v44 }
 0x245   :  { %v2279_v41 = vpop.eup %2278  ;;  %v1418_v0 = vadd.f32 1.0, %v2277_v55 }
 0x246   :  { %v1512_v22 = vsel %vm1511_vm7, %v2275_v35, %v1508_v59  ;;  %v1520_v53 = vmul.f32 %v2279_v41, %v1417_v20  ;;  %2280 = vpow2.f32 %v2176_v56  ;;  %v963_v8 = vpop.f32.mrf.mxu2  ;;  %vm1525_vm9 = vweird.f32 %v2279_v41 }
 0x247   :  { %v1517_v13 = vsel %vm1514_vm8, %v1516_v4, %v1512_v22  ;;  %2282 = vrcp.f32 %v1418_v0  ;;  %v1180_v19 = vpop.xlane.xlu2 %1179  ;;  %v964_v21 = vadd.f32 %v2877_v9, %v963_v8  ;;  %vm1526_vm11 = vmor %vm1524_vm10, %vm1525_vm9  ;;  %v1543_v57 = vand.u32 2147483647, %v1418_v0 }
 0x248   :  { %1929 = vst.msk [vmem:[%s3297_s10 + $0x20] sm:$0xff] %vm1924_vm4, %v1517_v13  ;;  %v1521_v63 = vsub.f32 1.0, %v1520_v53  ;;  %v1258_v23 = vadd.f32 %v1180_v19, %v2930_v17  ;;  %v1545_v58 = vand.u32 2147483648, %v1418_v0  ;;  %vm1539_vm14 = vweird.f32 %v1418_v0 }
 0x249   :  { %v1145_v33 = vmul.f32 %v2882_v11, %v964_v21  ;;  %vm1544_vm1 = vcmp.eq.f32.partialorder %v1543_v57, 8.507059e+37 }
 0x24a   :  { %v1522_v12 = vmul.f32 %v2279_v41, %v1521_v63  ;;  %v1292_v3 = vadd.f32 %v3031_v32, %v1258_v23  ;;  %v1546_v53 = vor.u32 1.1754944e-38, %v1545_v58 }
 0x24b   :  { %v1223_v6 = vsel %vm329_vm0, %v1145_v33, 0.0 }
 0x24c   :  { %v2281_v34 = vpop.eup %2280  ;;  %v1523_v35 = vadd.f32 %v2279_v41, %v1522_v12  ;;  %v2177_v38 = vmul.f32 -1.442695, %v1292_v3  ;;  %1224 = vadd.xlane.f32.xlu2 %v1223_v6 }
 0x24d   :  { %v2283_v39 = vpop.eup %2282  ;;  %v1419_v45 = vadd.f32 1.0, %v2281_v34 }
 0x24e   :  { %v1527_v17 = vsel %vm1526_vm11, %v2279_v41, %v1523_v35  ;;  %v1535_v46 = vmul.f32 %v2283_v39, %v1418_v0  ;;  %2284 = vpow2.f32 %v2177_v38  ;;  %v966_v54 = vpop.f32.mrf.mxu3  ;;  %vm1540_vm13 = vweird.f32 %v2283_v39 }
 0x24f   :  { %v1532_v48 = vsel %vm1529_vm12, %v1531_v42, %v1527_v17  ;;  %2286 = vrcp.f32 %v1419_v45  ;;  %v1183_v50 = vpop.xlane.xlu0 %1182  ;;  %v967_v7 = vadd.f32 %v2877_v9, %v966_v54  ;;  %vm1541_vm15 = vmor %vm1539_vm14, %vm1540_vm13  ;;  %v1558_v31 = vand.u32 2147483647, %v1419_v45 }
 0x250   :  { %1930 = vst.msk [vmem:[%s3297_s10 + $0x28] sm:$0xff] %vm1924_vm4, %v1532_v48  ;;  %v1536_v20 = vsub.f32 1.0, %v1535_v46  ;;  %v1259_v51 = vadd.f32 %v1183_v50, %v2938_v27  ;;  %v1560_v12 = vand.u32 2147483648, %v1419_v45  ;;  %vm1554_vm3 = vweird.f32 %v1419_v45 }
 0x251   :  { %v1146_v59 = vmul.f32 %v2882_v11, %v967_v7  ;;  %vm1559_vm6 = vcmp.eq.f32.partialorder %v1558_v31, 8.507059e+37 }
 0x252   :  { %v1537_v61 = vmul.f32 %v2283_v39, %v1536_v20  ;;  %v1293_v55 = vadd.f32 %v3031_v32, %v1259_v51  ;;  %v1561_v17 = vor.u32 1.1754944e-38, %v1560_v12 }
 0x253   :  { %v1226_v4 = vsel %vm329_vm0, %v1146_v59, 0.0 }
 0x254   :  { %v2285_v56 = vpop.eup %2284  ;;  %v1538_v44 = vadd.f32 %v2283_v39, %v1537_v61  ;;  %v2178_v41 = vmul.f32 -1.442695, %v1293_v55  ;;  %1227 = vadd.xlane.f32.xlu0 %v1226_v4 }
 0x255   :  { %v2287_v22 = vpop.eup %2286  ;;  %v1420_v8 = vadd.f32 1.0, %v2285_v56 }
 0x256   :  { %v1542_v27 = vsel %vm1541_vm15, %v2283_v39, %v1538_v44  ;;  %v1550_v13 = vmul.f32 %v2287_v22, %v1419_v45  ;;  %2288 = vpow2.f32 %v2178_v41  ;;  %v968_v19 = vpop.f32.mrf.mxu3  ;;  %vm1555_vm2 = vweird.f32 %v2287_v22 }
 0x257   :  { %v1547_v63 = vsel %vm1544_vm1, %v1546_v53, %v1542_v27  ;;  %2290 = vrcp.f32 %v1420_v8  ;;  %v1186_v21 = vpop.xlane.xlu1 %1185  ;;  %v969_v23 = vadd.f32 %v2877_v9, %v968_v19  ;;  %vm1556_vm5 = vmor %vm1554_vm3, %vm1555_vm2  ;;  %v1573_v57 = vand.u32 2147483647, %v1420_v8 }
 0x258   :  { %1931 = vst.msk [vmem:[%s3297_s10 + $0x30] sm:$0xff] %vm1924_vm4, %v1547_v63  ;;  %v1551_v0 = vsub.f32 1.0, %v1550_v13  ;;  %v1260_v29 = vadd.f32 %v1186_v21, %v2947_v43  ;;  %v1575_v58 = vand.u32 2147483648, %v1420_v8  ;;  %vm1569_vm8 = vweird.f32 %v1420_v8 }
 0x259   :  { %v1147_v34 = vmul.f32 %v2882_v11, %v969_v23  ;;  %vm1574_vm10 = vcmp.eq.f32.partialorder %v1573_v57, 8.507059e+37 }
 0x25a   :  { %v1552_v3 = vmul.f32 %v2287_v22, %v1551_v0  ;;  %v1294_v33 = vadd.f32 %v3031_v32, %v1260_v29  ;;  %v1576_v53 = vor.u32 1.1754944e-38, %v1575_v58  ;;  %v3150_v58 = vld [vmem:[%s3295_s8] ss:$0 sm:$0xff] }
 0x25b   :  { %v1229_v39 = vsel %vm329_vm0, %v1147_v34, 0.0 }
 0x25c   :  { %v2289_v35 = vpop.eup %2288  ;;  %v1553_v38 = vadd.f32 %v2287_v22, %v1552_v3  ;;  %v2179_v6 = vmul.f32 -1.442695, %v1294_v33  ;;  %1230 = vadd.xlane.f32.xlu1 %v1229_v39 }
 0x25d   :  { %v2291_v42 = vpop.eup %2290  ;;  %v1421_v46 = vadd.f32 1.0, %v2289_v35 }
 0x25e   :  { %v1557_v43 = vsel %vm1556_vm5, %v2287_v22, %v1553_v38  ;;  %v1565_v54 = vmul.f32 %v2291_v42, %v1420_v8  ;;  %2292 = vpow2.f32 %v2179_v6  ;;  %v971_v48 = vpop.f32.mrf.mxu3  ;;  %vm1570_vm7 = vweird.f32 %v2291_v42 }
 0x25f   :  { %v1562_v50 = vsel %vm1559_vm6, %v1561_v17, %v1557_v43  ;;  %2294 = vrcp.f32 %v1421_v46  ;;  %v1189_v20 = vpop.xlane.xlu2 %1188  ;;  %v972_v7 = vadd.f32 %v2877_v9, %v971_v48  ;;  %vm1571_vm9 = vmor %vm1569_vm8, %vm1570_vm7  ;;  %v1588_v29 = vand.u32 2147483647, %v1421_v46 }
 0x260   :  { %1932 = vst.msk [vmem:[%s3297_s10 + $0x38] sm:$0xff] %vm1924_vm4, %v1562_v50  ;;  %v1566_v45 = vsub.f32 1.0, %v1565_v54  ;;  %v1261_v51 = vadd.f32 %v1189_v20, %v2941_v30  ;;  %v1590_v31 = vand.u32 2147483648, %v1421_v46  ;;  %vm1584_vm12 = vweird.f32 %v1421_v46 }
 0x261   :  { %v1148_v59 = vmul.f32 %v2882_v11, %v972_v7  ;;  %vm1589_vm14 = vcmp.eq.f32.partialorder %v1588_v29, 8.507059e+37 }
 0x262   :  { %v1567_v61 = vmul.f32 %v2291_v42, %v1566_v45  ;;  %v1295_v55 = vadd.f32 %v3031_v32, %v1261_v51 }
 0x263   :  { %v1232_v4 = vsel %vm329_vm0, %v1148_v59, 0.0 }
 0x264   :  { %v2293_v56 = vpop.eup %2292  ;;  %v1568_v44 = vadd.f32 %v2291_v42, %v1567_v61  ;;  %v2180_v41 = vmul.f32 -1.442695, %v1295_v55  ;;  %1233 = vadd.xlane.f32.xlu2 %v1232_v4 }
 0x265   :  { %v2295_v22 = vpop.eup %2294  ;;  %v1422_v27 = vadd.f32 1.0, %v2293_v56 }
 0x266   :  { %v1572_v30 = vsel %vm1571_vm9, %v2291_v42, %v1568_v44  ;;  %v1580_v13 = vmul.f32 %v2295_v22, %v1421_v46  ;;  %2296 = vpow2.f32 %v2180_v41  ;;  %v973_v19 = vpop.f32.mrf.mxu3  ;;  %vm1585_vm11 = vweird.f32 %v2295_v22  ;;  %v3142_v46 = vld [vmem:[%s3294_s6] ss:$0 sm:$0xff] }
 0x267   :  { %v1577_v63 = vsel %vm1574_vm10, %v1576_v53, %v1572_v30  ;;  %2298 = vrcp.f32 %v1422_v27  ;;  %v1192_v21 = vpop.xlane.xlu0 %1191  ;;  %v974_v0 = vadd.f32 %v2877_v9, %v973_v19  ;;  %vm1586_vm13 = vmor %vm1584_vm12, %vm1585_vm11  ;;  %v1591_v42 = vor.u32 1.1754944e-38, %v1590_v31 }
 0x268   :  { %1933 = vst.msk [vmem:[%s3297_s10 + $0x40] sm:$0xff] %vm1924_vm4, %v1577_v63  ;;  %v1581_v8 = vsub.f32 1.0, %v1580_v13  ;;  %v1262_v23 = vadd.f32 %v1192_v21, %v2950_v47  ;;  %v1603_v45 = vand.u32 2147483647, %v1422_v27  ;;  %v1605_v7 = vand.u32 2147483648, %v1422_v27 }
 0x269   :  { %v1149_v33 = vmul.f32 %v2882_v11, %v974_v0  ;;  %vm1599_vm1 = vweird.f32 %v1422_v27 }
 0x26a   :  { %v1582_v12 = vmul.f32 %v2295_v22, %v1581_v8  ;;  %v1296_v3 = vadd.f32 %v3031_v32, %v1262_v23  ;;  %v1606_v41 = vor.u32 1.1754944e-38, %v1605_v7  ;;  %vm1604_vm3 = vcmp.eq.f32.partialorder %v1603_v45, 8.507059e+37 }
 0x26b   :  { %v1235_v6 = vsel %vm329_vm0, %v1149_v33, 0.0 }
 0x26c   :  { %v2297_v34 = vpop.eup %2296  ;;  %v1583_v35 = vadd.f32 %v2295_v22, %v1582_v12  ;;  %v2181_v38 = vmul.f32 -1.442695, %v1296_v3  ;;  %1236 = vadd.xlane.f32.xlu0 %v1235_v6 }
 0x26d   :  { %v2299_v39 = vpop.eup %2298  ;;  %v1423_v9 = vadd.f32 1.0, %v2297_v34 }
 0x26e   :  { %v1587_v47 = vsel %vm1586_vm13, %v2295_v22, %v1583_v35  ;;  %v1595_v17 = vmul.f32 %v2299_v39, %v1422_v27  ;;  %2300 = vpow2.f32 %v2181_v38  ;;  %v976_v43 = vpop.f32.mrf.mxu3  ;;  %vm1600_vm15 = vweird.f32 %v2299_v39 }
 0x26f   :  { %v1592_v54 = vsel %vm1589_vm14, %v1591_v42, %v1587_v47  ;;  %2302 = vrcp.f32 %v1423_v9  ;;  %v1195_v48 = vpop.xlane.xlu1 %1194  ;;  %v977_v50 = vadd.f32 %v3142_v46, %v976_v43  ;;  %vm1601_vm2 = vmor %vm1599_vm1, %vm1600_vm15  ;;  %v1618_v8 = vand.u32 2147483647, %v1423_v9 }
 0x270   :  { %1934 = vst.msk [vmem:[%s3297_s10 + $0x48] sm:$0xff] %vm1924_vm4, %v1592_v54  ;;  %v1596_v11 = vsub.f32 1.0, %v1595_v17  ;;  %v1263_v20 = vadd.f32 %v1195_v48, %v2962_v62  ;;  %v1620_v0 = vand.u32 2147483648, %v1423_v9  ;;  %vm1614_vm6 = vweird.f32 %v1423_v9 }
 0x271   :  { %v1150_v61 = vmul.f32 %v3150_v58, %v977_v50  ;;  %vm1619_vm8 = vcmp.eq.f32.partialorder %v1618_v8, 8.507059e+37 }
 0x272   :  { %v1597_v51 = vmul.f32 %v2299_v39, %v1596_v11  ;;  %v1297_v57 = vadd.f32 %v3031_v32, %v1263_v20  ;;  %v1621_v38 = vor.u32 1.1754944e-38, %v1620_v0 }
 0x273   :  { %v1238_v44 = vsel %vm329_vm0, %v1150_v61, 0.0 }
 0x274   :  { %v2301_v55 = vpop.eup %2300  ;;  %v1598_v59 = vadd.f32 %v2299_v39, %v1597_v51  ;;  %v2182_v56 = vmul.f32 -1.442695, %v1297_v57  ;;  %1239 = vadd.xlane.f32.xlu1 %v1238_v44 }
 0x275   :  { %v2303_v62 = vpop.eup %2302  ;;  %v1424_v4 = vadd.f32 1.0, %v2301_v55 }
 0x276   :  { %v1602_v22 = vsel %vm1601_vm2, %v2299_v39, %v1598_v59  ;;  %v1610_v53 = vmul.f32 %v2303_v62, %v1423_v9  ;;  %2304 = vpow2.f32 %v2182_v56  ;;  %v978_v30 = vpop.f32.mrf.mxu3  ;;  %vm1615_vm5 = vweird.f32 %v2303_v62 }
 0x277   :  { %v1607_v13 = vsel %vm1604_vm3, %v1606_v41, %v1602_v22  ;;  %2306 = vrcp.f32 %v1424_v4  ;;  %v1198_v19 = vpop.xlane.xlu2 %1197  ;;  %v979_v63 = vadd.f32 %v3142_v46, %v978_v30  ;;  %vm1616_vm7 = vmor %vm1614_vm6, %vm1615_vm5  ;;  %v1633_v48 = vand.u32 2147483647, %v1424_v4 }
 0x278   :  { %1935 = vst.msk [vmem:[%s3297_s10 + $0x50] sm:$0xff] %vm1924_vm4, %v1607_v13  ;;  %v1611_v27 = vsub.f32 1.0, %v1610_v53  ;;  %v1264_v21 = vadd.f32 %v1198_v19, %v2954_v49  ;;  %v1635_v11 = vand.u32 2147483648, %v1424_v4  ;;  %vm1629_vm10 = vweird.f32 %v1424_v4 }
 0x279   :  { %v1151_v31 = vmul.f32 %v3150_v58, %v979_v63  ;;  %vm1634_vm12 = vcmp.eq.f32.partialorder %v1633_v48, 8.507059e+37 }
 0x27a   :  { %v1612_v23 = vmul.f32 %v2303_v62, %v1611_v27  ;;  %v1298_v29 = vadd.f32 %v3031_v32, %v1264_v21  ;;  %v1636_v59 = vor.u32 1.1754944e-38, %v1635_v11 }
 0x27b   :  { %v1241_v34 = vsel %vm329_vm0, %v1151_v31, 0.0 }
 0x27c   :  { %v2305_v12 = vpop.eup %2304  ;;  %v1613_v3 = vadd.f32 %v2303_v62, %v1612_v23  ;;  %v2183_v33 = vmul.f32 -1.442695, %v1298_v29  ;;  %1242 = vadd.xlane.f32.xlu2 %v1241_v34 }
 0x27d   :  { %v2307_v35 = vpop.eup %2306  ;;  %v1425_v6 = vadd.f32 1.0, %v2305_v12 }
 0x27e   :  { %v1617_v49 = vsel %vm1616_vm7, %v2303_v62, %v1613_v3  ;;  %v1625_v39 = vmul.f32 %v2307_v35, %v1424_v4  ;;  %2308 = vpow2.f32 %v2183_v33  ;;  %v981_v42 = vpop.f32.mrf.mxu3  ;;  %vm1630_vm9 = vweird.f32 %v2307_v35 }
 0x27f   :  { %v1622_v47 = vsel %vm1619_vm8, %v1621_v38, %v1617_v49  ;;  %2310 = vrcp.f32 %v1425_v6  ;;  %v1201_v17 = vpop.xlane.xlu0 %1200  ;;  %v982_v43 = vadd.f32 %v3142_v46, %v981_v42  ;;  %vm1631_vm11 = vmor %vm1629_vm10, %vm1630_vm9  ;;  %v1648_v13 = vand.u32 2147483647, %v1425_v6 }
 0x280   :  { %1936 = vst.msk [vmem:[%s3297_s10 + $0x58] sm:$0xff] %vm1924_vm4, %v1622_v47  ;;  %v1626_v9 = vsub.f32 1.0, %v1625_v39  ;;  %v1265_v54 = vadd.f32 %v1201_v17, %v2965_v2  ;;  %v1650_v19 = vand.u32 2147483648, %v1425_v6  ;;  %vm1644_vm14 = vweird.f32 %v1425_v6 }
 0x281   :  { %v1152_v45 = vmul.f32 %v3150_v58, %v982_v43  ;;  %vm1649_vm1 = vcmp.eq.f32.partialorder %v1648_v13, 8.507059e+37 }
 0x282   :  { %v1627_v50 = vmul.f32 %v2307_v35, %v1626_v9  ;;  %v1299_v20 = vadd.f32 %v3031_v32, %v1265_v54  ;;  %v1651_v12 = vor.u32 1.1754944e-38, %v1650_v19 }
 0x283   :  { %v1244_v61 = vsel %vm329_vm0, %v1152_v45, 0.0 }
 0x284   :  { %v2309_v7 = vpop.eup %2308  ;;  %v1628_v51 = vadd.f32 %v2307_v35, %v1627_v50  ;;  %v2184_v57 = vmul.f32 -1.442695, %v1299_v20  ;;  %1245 = vadd.xlane.f32.xlu0 %v1244_v61 }
 0x285   :  { %v2311_v55 = vpop.eup %2310  ;;  %v1426_v56 = vadd.f32 1.0, %v2309_v7 }
 0x286   :  { %v1632_v2 = vsel %vm1631_vm11, %v2307_v35, %v1628_v51  ;;  %v1640_v44 = vmul.f32 %v2311_v55, %v1425_v6  ;;  %2312 = vpow2.f32 %v2184_v57  ;;  %v983_v62 = vpop.f32.mrf.mxu3  ;;  %vm1645_vm13 = vweird.f32 %v2311_v55 }
 0x287   :  { %v1637_v41 = vsel %vm1634_vm12, %v1636_v59, %v1632_v2  ;;  %2314 = vrcp.f32 %v1426_v56  ;;  %v1204_v22 = vpop.xlane.xlu1 %1203  ;;  %v984_v53 = vadd.f32 %v3142_v46, %v983_v62  ;;  %vm1646_vm15 = vmor %vm1644_vm14, %vm1645_vm13  ;;  %v1665_v35 = vand.u32 2147483648, %v1426_v56 }
 0x288   :  { %1937 = vst.msk [vmem:[%s3297_s10 + $0x60] sm:$0xff] %vm1924_vm4, %v1637_v41  ;;  %v1641_v4 = vsub.f32 1.0, %v1640_v44  ;;  %v1266_v30 = vadd.f32 %v1204_v22, %v2973_v18  ;;  %v1663_v49 = vand.u32 2147483647, %v1426_v56  ;;  %vm1659_vm2 = vweird.f32 %v1426_v56 }
 0x289   :  { %v1153_v21 = vmul.f32 %v3150_v58, %v984_v53  ;;  %v1666_v9 = vor.u32 1.1754944e-38, %v1665_v35 }
 0x28a   :  { %v1642_v27 = vmul.f32 %v2311_v55, %v1641_v4  ;;  %v1300_v63 = vadd.f32 %v3031_v32, %v1266_v30  ;;  %vm1664_vm5 = vcmp.eq.f32.partialorder %v1663_v49, 8.507059e+37 }
 0x28b   :  { %v1247_v29 = vsel %vm329_vm0, %v1153_v21, 0.0 }
 0x28c   :  { %v2313_v8 = vpop.eup %2312  ;;  %v1643_v0 = vadd.f32 %v2311_v55, %v1642_v27  ;;  %v2185_v23 = vmul.f32 -1.442695, %v1300_v63  ;;  %1248 = vadd.xlane.f32.xlu1 %v1247_v29 }
 0x28d   :  { %v2315_v31 = vpop.eup %2314  ;;  %v1427_v46 = vadd.f32 1.0, %v2313_v8 }
 0x28e   :  { %v1647_v18 = vsel %vm1646_vm15, %v2311_v55, %v1643_v0  ;;  %v1655_v3 = vmul.f32 %v2315_v31, %v1426_v56  ;;  %2316 = vpow2.f32 %v2185_v23  ;;  %vm1660_vm0 = vweird.f32 %v2315_v31 }
 0x28f   :  { %v1652_v33 = vsel %vm1649_vm1, %v1651_v12, %v1647_v18  ;;  %2318 = vrcp.f32 %v1427_v46  ;;  %v1207_v34 = vpop.xlane.xlu2 %1206  ;;  %vm1661_vm3 = vmor %vm1659_vm2, %vm1660_vm0  ;;  %v1680_v45 = vand.u32 2147483648, %v1427_v46  ;;  %v1678_v57 = vand.u32 2147483647, %v1427_v46 }
 0x290   :  { %1938 = vst.msk [vmem:[%s3297_s10 + $0x68] sm:$0xff] %vm1924_vm4, %v1652_v33  ;;  %v1656_v58 = vsub.f32 1.0, %v1655_v3  ;;  %v1267_v38 = vadd.f32 %v1207_v34, %v2967_v5  ;;  %vm1674_vm7 = vweird.f32 %v1427_v46 }
 0x291   :  { %v1681_v56 = vor.u32 1.1754944e-38, %v1680_v45  ;;  %vm1679_vm9 = vcmp.eq.f32.partialorder %v1678_v57, 8.507059e+37 }
 0x292   :  { %v1657_v6 = vmul.f32 %v2315_v31, %v1656_v58  ;;  %v1301_v39 = vadd.f32 %v3031_v32, %v1267_v38 }
 0x294   :  { %v2317_v42 = vpop.eup %2316  ;;  %v1658_v47 = vadd.f32 %v2315_v31, %v1657_v6  ;;  %v2186_v54 = vmul.f32 -1.442695, %v1301_v39 }
 0x295   :  { %v2319_v17 = vpop.eup %2318  ;;  %v1428_v43 = vadd.f32 1.0, %v2317_v42 }
 0x296   :  { %v1662_v48 = vsel %vm1661_vm3, %v2315_v31, %v1658_v47  ;;  %v1670_v11 = vmul.f32 %v2319_v17, %v1427_v46  ;;  %vm1675_vm6 = vweird.f32 %v2319_v17 }
 0x297   :  { %v1667_v50 = vsel %vm1664_vm5, %v1666_v9, %v1662_v48  ;;  %2320 = vrcp.f32 %v1428_v43  ;;  %v1210_v20 = vpop.xlane.xlu0 %1209  ;;  %vm1676_vm8 = vmor %vm1674_vm7, %vm1675_vm6  ;;  %v1695_v30 = vand.u32 2147483648, %v1428_v43  ;;  %v1693_v19 = vand.u32 2147483647, %v1428_v43 }
 0x298   :  { %1939 = vst.msk [vmem:[%s3297_s10 + $0x70] sm:$0xff] %vm1924_vm4, %v1667_v50  ;;  %v1671_v5 = vsub.f32 1.0, %v1670_v11  ;;  %2322 = vpow2.f32 %v2186_v54  ;;  %v1268_v7 = vadd.f32 %v1210_v20, %v2977_v16  ;;  %vm1689_vm11 = vweird.f32 %v1428_v43 }
 0x299   :  { %v1696_v0 = vor.u32 1.1754944e-38, %v1695_v30  ;;  %vm1694_vm13 = vcmp.eq.f32.partialorder %v1693_v19, 8.507059e+37 }
 0x29a   :  { %v1672_v51 = vmul.f32 %v2319_v17, %v1671_v5  ;;  %v1302_v61 = vadd.f32 %v3031_v32, %v1268_v7 }
 0x29c   :  { %v1673_v55 = vadd.f32 %v2319_v17, %v1672_v51  ;;  %v2187_v2 = vmul.f32 -1.442695, %v1302_v61 }
 0x29d   :  { %v2321_v59 = vpop.eup %2320 }
 0x29e   :  { %v2323_v44 = vpop.eup %2322  ;;  %v1677_v62 = vsel %vm1676_vm8, %v2319_v17, %v1673_v55  ;;  %v1685_v41 = vmul.f32 %v2321_v59, %v1428_v43  ;;  %2324 = vpow2.f32 %v2187_v2  ;;  %vm1690_vm10 = vweird.f32 %v2321_v59 }
 0x29f   :  { %v1682_v22 = vsel %vm1679_vm9, %v1681_v56, %v1677_v62  ;;  %v1429_v4 = vadd.f32 1.0, %v2323_v44  ;;  %v1213_v53 = vpop.xlane.xlu1 %1212  ;;  %vm1691_vm12 = vmor %vm1689_vm11, %vm1690_vm10 }
 0x2a0   :  { %1940 = vst.msk [vmem:[%s3297_s10 + $0x78] sm:$0xff] %vm1924_vm4, %v1682_v22  ;;  %v1686_v16 = vsub.f32 1.0, %v1685_v41  ;;  %v1269_v27 = vadd.f32 %v1213_v53, %v2986_v26 }
 0x2a1   :  { %2326 = vrcp.f32 %v1429_v4  ;;  %v1710_v58 = vand.u32 2147483648, %v1429_v4  ;;  %v1708_v38 = vand.u32 2147483647, %v1429_v4  ;;  %vm1704_vm15 = vweird.f32 %v1429_v4 }
 0x2a2   :  { %v1687_v13 = vmul.f32 %v2321_v59, %v1686_v16  ;;  %v1303_v21 = vadd.f32 %v3031_v32, %v1269_v27 }
 0x2a3   :  { %v1711_v47 = vor.u32 1.1754944e-38, %v1710_v58  ;;  %vm1709_vm0 = vcmp.eq.f32.partialorder %v1708_v38, 8.507059e+37 }
 0x2a4   :  { %v1688_v63 = vadd.f32 %v2321_v59, %v1687_v13  ;;  %v2325_v8 = vpop.eup %2324  ;;  %v2188_v31 = vmul.f32 -1.442695, %v1303_v21 }
 0x2a5   :  { %v1430_v29 = vadd.f32 1.0, %v2325_v8 }
 0x2a6   :  { %v1692_v23 = vsel %vm1691_vm12, %v2321_v59, %v1688_v63 }
 0x2a7   :  { %v2327_v12 = vpop.eup %2326  ;;  %v1697_v46 = vsel %vm1694_vm13, %v1696_v0, %v1692_v23  ;;  %2328 = vrcp.f32 %v1430_v29  ;;  %v1216_v26 = vpop.xlane.xlu2 %1215  ;;  %v1725_v50 = vand.u32 2147483648, %v1430_v29  ;;  %v1723_v20 = vand.u32 2147483647, %v1430_v29 }
 0x2a8   :  { %1941 = vst.msk [vmem:[%s3297_s10 + $0x80] sm:$0xff] %vm1924_vm4, %v1697_v46  ;;  %v1700_v18 = vmul.f32 %v2327_v12, %v1429_v4  ;;  %2330 = vpow2.f32 %v2188_v31  ;;  %v1270_v3 = vadd.f32 %v1216_v26, %v2980_v24  ;;  %vm1705_vm14 = vweird.f32 %v2327_v12 }
 0x2a9   :  { %vm1706_vm1 = vmor %vm1704_vm15, %vm1705_vm14  ;;  %vm1719_vm3 = vweird.f32 %v1430_v29  ;;  %v1726_v61 = vor.u32 1.1754944e-38, %v1725_v50  ;;  %vm1724_vm6 = vcmp.eq.f32.partialorder %v1723_v20, 8.507059e+37 }
 0x2aa   :  { %v1701_v33 = vsub.f32 1.0, %v1700_v18  ;;  %v1304_v34 = vadd.f32 %v3031_v32, %v1270_v3 }
 0x2ac   :  { %v1702_v35 = vmul.f32 %v2327_v12, %v1701_v33  ;;  %v2189_v6 = vmul.f32 -1.442695, %v1304_v34 }
 0x2ad   :  { %v2329_v49 = vpop.eup %2328 }
 0x2ae   :  { %v1703_v39 = vadd.f32 %v2327_v12, %v1702_v35  ;;  %v2331_v42 = vpop.eup %2330  ;;  %v1715_v17 = vmul.f32 %v2329_v49, %v1430_v29  ;;  %2332 = vpow2.f32 %v2189_v6  ;;  %vm1720_vm2 = vweird.f32 %v2329_v49 }
 0x2af   :  { %v1431_v43 = vadd.f32 1.0, %v2331_v42  ;;  %v1219_v24 = vpop.xlane.xlu0 %1218  ;;  %vm1721_vm5 = vmor %vm1719_vm3, %vm1720_vm2 }
 0x2b0   :  { %v1707_v9 = vsel %vm1706_vm1, %v2327_v12, %v1703_v39  ;;  %v1716_v48 = vsub.f32 1.0, %v1715_v17  ;;  %v1271_v11 = vadd.f32 %v1219_v24, %v2989_v36 }
 0x2b1   :  { %v1712_v54 = vsel %vm1709_vm0, %v1711_v47, %v1707_v9  ;;  %2334 = vrcp.f32 %v1431_v43  ;;  %v1740_v4 = vand.u32 2147483648, %v1431_v43  ;;  %v1738_v30 = vand.u32 2147483647, %v1431_v43 }
 0x2b2   :  { %1942 = vst.msk [vmem:[%s3297_s10 + $0x88] sm:$0xff] %vm1924_vm4, %v1712_v54  ;;  %v1717_v5 = vmul.f32 %v2329_v49, %v1716_v48  ;;  %v1305_v45 = vadd.f32 %v3031_v32, %v1271_v11  ;;  %vm1734_vm8 = vweird.f32 %v1431_v43 }
 0x2b3   :  { %v1741_v8 = vor.u32 1.1754944e-38, %v1740_v4  ;;  %vm1739_vm10 = vcmp.eq.f32.partialorder %v1738_v30, 8.507059e+37 }
 0x2b4   :  { %v2333_v7 = vpop.eup %2332  ;;  %v1718_v51 = vadd.f32 %v2329_v49, %v1717_v5  ;;  %v2190_v57 = vmul.f32 -1.442695, %v1305_v45 }
 0x2b5   :  { %v1432_v55 = vadd.f32 1.0, %v2333_v7 }
 0x2b6   :  { %v1722_v36 = vsel %vm1721_vm5, %v2329_v49, %v1718_v51  ;;  %2336 = vpow2.f32 %v2190_v57 }
 0x2b7   :  { %v2335_v59 = vpop.eup %2334  ;;  %v1727_v56 = vsel %vm1724_vm6, %v1726_v61, %v1722_v36  ;;  %2338 = vrcp.f32 %v1432_v55  ;;  %v1222_v2 = vpop.xlane.xlu1 %1221  ;;  %v1755_v12 = vand.u32 2147483648, %v1432_v55  ;;  %v1753_v18 = vand.u32 2147483647, %v1432_v55 }
 0x2b8   :  { %1943 = vst.msk [vmem:[%s3297_s10 + $0x90] sm:$0xff] %vm1924_vm4, %v1727_v56  ;;  %v1730_v44 = vmul.f32 %v2335_v59, %v1431_v43  ;;  %v1272_v62 = vadd.f32 %v1222_v2, %v2999_v52  ;;  %vm1735_vm7 = vweird.f32 %v2335_v59  ;;  %vm1749_vm12 = vweird.f32 %v1432_v55 }
 0x2b9   :  { %vm1736_vm9 = vmor %vm1734_vm8, %vm1735_vm7  ;;  %v1756_v35 = vor.u32 1.1754944e-38, %v1755_v12  ;;  %vm1754_vm14 = vcmp.eq.f32.partialorder %v1753_v18, 8.507059e+37 }
 0x2ba   :  { %v1731_v41 = vsub.f32 1.0, %v1730_v44  ;;  %v1306_v22 = vadd.f32 %v3031_v32, %v1272_v62 }
 0x2bc   :  { %v2337_v16 = vpop.eup %2336  ;;  %v1732_v53 = vmul.f32 %v2335_v59, %v1731_v41  ;;  %v2191_v13 = vmul.f32 -1.442695, %v1306_v22 }
 0x2bd   :  { %v2339_v19 = vpop.eup %2338  ;;  %v1433_v27 = vadd.f32 1.0, %v2337_v16 }
 0x2be   :  { %v1733_v63 = vadd.f32 %v2335_v59, %v1732_v53  ;;  %v1745_v21 = vmul.f32 %v2339_v19, %v1432_v55  ;;  %2340 = vpow2.f32 %v2191_v13  ;;  %vm1750_vm11 = vweird.f32 %v2339_v19 }
 0x2bf   :  { %2342 = vrcp.f32 %v1433_v27  ;;  %v1225_v0 = vpop.xlane.xlu2 %1224  ;;  %vm1751_vm13 = vmor %vm1749_vm12, %vm1750_vm11  ;;  %v1770_v17 = vand.u32 2147483648, %v1433_v27  ;;  %v1768_v43 = vand.u32 2147483647, %v1433_v27  ;;  %vm1764_vm1 = vweird.f32 %v1433_v27 }
 0x2c0   :  { %v1737_v52 = vsel %vm1736_vm9, %v2335_v59, %v1733_v63  ;;  %v1746_v23 = vsub.f32 1.0, %v1745_v21  ;;  %v1273_v29 = vadd.f32 %v1225_v0, %v2992_v40 }
 0x2c1   :  { %v1742_v31 = vsel %vm1739_vm10, %v1741_v8, %v1737_v52  ;;  %v1771_v5 = vor.u32 1.1754944e-38, %v1770_v17  ;;  %vm1769_vm2 = vcmp.eq.f32.partialorder %v1768_v43, 8.507059e+37 }
 0x2c2   :  { %1944 = vst.msk [vmem:[%s3297_s10 + $0x98] sm:$0xff] %vm1924_vm4, %v1742_v31  ;;  %v1747_v46 = vmul.f32 %v2339_v19, %v1746_v23  ;;  %v1307_v26 = vadd.f32 %v3031_v32, %v1273_v29 }
 0x2c4   :  { %v2341_v3 = vpop.eup %2340  ;;  %v1748_v33 = vadd.f32 %v2339_v19, %v1747_v46  ;;  %v2192_v58 = vmul.f32 -1.442695, %v1307_v26 }
 0x2c5   :  { %v2343_v34 = vpop.eup %2342  ;;  %v1434_v40 = vadd.f32 1.0, %v2341_v3 }
 0x2c6   :  { %v1752_v38 = vsel %vm1751_vm13, %v2339_v19, %v1748_v33  ;;  %v1760_v6 = vmul.f32 %v2343_v34, %v1433_v27  ;;  %2344 = vpow2.f32 %v2192_v58  ;;  %vm1765_vm15 = vweird.f32 %v2343_v34 }
 0x2c7   :  { %v1757_v49 = vsel %vm1754_vm14, %v1756_v35, %v1752_v38  ;;  %2346 = vrcp.f32 %v1434_v40  ;;  %v1228_v39 = vpop.xlane.xlu0 %1227  ;;  %vm1766_vm0 = vmor %vm1764_vm1, %vm1765_vm15  ;;  %v1785_v55 = vand.u32 2147483648, %v1434_v40  ;;  %v1783_v59 = vand.u32 2147483647, %v1434_v40 }
 0x2c8   :  { %1945 = vst.msk [vmem:[%s3297_s10 + $0xa0] sm:$0xff] %vm1924_vm4, %v1757_v49  ;;  %v1761_v42 = vsub.f32 1.0, %v1760_v6  ;;  %v1274_v47 = vadd.f32 %v1228_v39, %v3005_v60  ;;  %vm1779_vm5 = vweird.f32 %v1434_v40 }
 0x2c9   :  { %v1786_v22 = vor.u32 1.1754944e-38, %v1785_v55  ;;  %vm1784_vm7 = vcmp.eq.f32.partialorder %v1783_v59, 8.507059e+37 }
 0x2ca   :  { %v1762_v9 = vmul.f32 %v2343_v34, %v1761_v42  ;;  %v1308_v24 = vadd.f32 %v3031_v32, %v1274_v47 }
 0x2cc   :  { %v2345_v54 = vpop.eup %2344  ;;  %v1763_v48 = vadd.f32 %v2343_v34, %v1762_v9  ;;  %v2193_v11 = vmul.f32 -1.442695, %v1308_v24 }
 0x2cd   :  { %v2347_v50 = vpop.eup %2346  ;;  %v1435_v20 = vadd.f32 1.0, %v2345_v54 }
 0x2ce   :  { %v1767_v45 = vsel %vm1766_vm0, %v2343_v34, %v1763_v48  ;;  %v1775_v7 = vmul.f32 %v2347_v50, %v1434_v40  ;;  %2348 = vpow2.f32 %v2193_v11  ;;  %vm1780_vm3 = vweird.f32 %v2347_v50 }
 0x2cf   :  { %v1772_v51 = vsel %vm1769_vm2, %v1771_v5, %v1767_v45  ;;  %2350 = vrcp.f32 %v1435_v20  ;;  %v1231_v60 = vpop.xlane.xlu1 %1230  ;;  %vm1781_vm6 = vmor %vm1779_vm5, %vm1780_vm3  ;;  %v1800_v27 = vand.u32 2147483648, %v1435_v20  ;;  %v1798_v21 = vand.u32 2147483647, %v1435_v20 }
 0x2d0   :  { %1946 = vst.msk [vmem:[%s3297_s10 + $0xa8] sm:$0xff] %vm1924_vm4, %v1772_v51  ;;  %v1776_v57 = vsub.f32 1.0, %v1775_v7  ;;  %v1275_v61 = vadd.f32 %v1231_v60, %v3012_v1  ;;  %vm1794_vm9 = vweird.f32 %v1435_v20 }
 0x2d1   :  { %v1801_v31 = vor.u32 1.1754944e-38, %v1800_v27  ;;  %vm1799_vm11 = vcmp.eq.f32.partialorder %v1798_v21, 8.507059e+37 }
 0x2d2   :  { %v1777_v36 = vmul.f32 %v2347_v50, %v1776_v57  ;;  %v1309_v56 = vadd.f32 %v3031_v32, %v1275_v61 }
 0x2d4   :  { %v2349_v2 = vpop.eup %2348  ;;  %v1778_v44 = vadd.f32 %v2347_v50, %v1777_v36  ;;  %v2194_v62 = vmul.f32 -1.442695, %v1309_v56 }
 0x2d5   :  { %v2351_v41 = vpop.eup %2350  ;;  %v1436_v4 = vadd.f32 1.0, %v2349_v2 }
 0x2d6   :  { %v1782_v16 = vsel %vm1781_vm6, %v2347_v50, %v1778_v44  ;;  %v1790_v53 = vmul.f32 %v2351_v41, %v1435_v20  ;;  %2352 = vpow2.f32 %v2194_v62  ;;  %vm1795_vm8 = vweird.f32 %v2351_v41 }
 0x2d7   :  { %v1787_v30 = vsel %vm1784_vm7, %v1786_v22, %v1782_v16  ;;  %2354 = vrcp.f32 %v1436_v4  ;;  %v1234_v1 = vpop.xlane.xlu2 %1233  ;;  %vm1796_vm10 = vmor %vm1794_vm9, %vm1795_vm8  ;;  %v1815_v58 = vand.u32 2147483648, %v1436_v4  ;;  %v1813_v35 = vand.u32 2147483647, %v1436_v4 }
 0x2d8   :  { %1947 = vst.msk [vmem:[%s3297_s10 + $0xb0] sm:$0xff] %vm1924_vm4, %v1787_v30  ;;  %v1791_v13 = vsub.f32 1.0, %v1790_v53  ;;  %v1276_v19 = vadd.f32 %v1234_v1, %v3008_v37  ;;  %vm1809_vm13 = vweird.f32 %v1436_v4 }
 0x2d9   :  { %v1816_v42 = vor.u32 1.1754944e-38, %v1815_v58  ;;  %vm1814_vm15 = vcmp.eq.f32.partialorder %v1813_v35, 8.507059e+37 }
 0x2da   :  { %v1792_v63 = vmul.f32 %v2351_v41, %v1791_v13  ;;  %v1310_v8 = vadd.f32 %v3031_v32, %v1276_v19 }
 0x2dc   :  { %v2353_v0 = vpop.eup %2352  ;;  %v1793_v52 = vadd.f32 %v2351_v41, %v1792_v63  ;;  %v2195_v23 = vmul.f32 -1.442695, %v1310_v8 }
 0x2dd   :  { %v2355_v29 = vpop.eup %2354  ;;  %v1437_v12 = vadd.f32 1.0, %v2353_v0 }
 0x2de   :  { %v1797_v46 = vsel %vm1796_vm10, %v2351_v41, %v1793_v52  ;;  %v1805_v18 = vmul.f32 %v2355_v29, %v1436_v4  ;;  %2356 = vpow2.f32 %v2195_v23  ;;  %vm1810_vm12 = vweird.f32 %v2355_v29 }
 0x2df   :  { %v1802_v26 = vsel %vm1799_vm11, %v1801_v31, %v1797_v46  ;;  %2358 = vrcp.f32 %v1437_v12  ;;  %v1237_v37 = vpop.xlane.xlu0 %1236  ;;  %vm1811_vm14 = vmor %vm1809_vm13, %vm1810_vm12  ;;  %v1830_v48 = vand.u32 2147483648, %v1437_v12  ;;  %v1828_v50 = vand.u32 2147483647, %v1437_v12 }
 0x2e0   :  { %1948 = vst.msk [vmem:[%s3297_s10 + $0xb8] sm:$0xff] %vm1924_vm4, %v1802_v26  ;;  %v1806_v3 = vsub.f32 1.0, %v1805_v18  ;;  %v1277_v33 = vadd.f32 %v1237_v37, %v3016_v14  ;;  %vm1824_vm0 = vweird.f32 %v1437_v12 }
 0x2e1   :  { %v1831_v60 = vor.u32 1.1754944e-38, %v1830_v48  ;;  %vm1829_vm3 = vcmp.eq.f32.partialorder %v1828_v50, 8.507059e+37 }
 0x2e2   :  { %v1807_v34 = vmul.f32 %v2355_v29, %v1806_v3  ;;  %v1311_v40 = vadd.f32 %v3031_v32, %v1277_v33 }
 0x2e4   :  { %v2357_v38 = vpop.eup %2356  ;;  %v1808_v6 = vadd.f32 %v2355_v29, %v1807_v34  ;;  %v2196_v49 = vmul.f32 -1.442695, %v1311_v40 }
 0x2e5   :  { %v2359_v39 = vpop.eup %2358  ;;  %v1438_v47 = vadd.f32 1.0, %v2357_v38 }
 0x2e6   :  { %v1812_v17 = vsel %vm1811_vm14, %v2355_v29, %v1808_v6  ;;  %v1820_v9 = vmul.f32 %v2359_v39, %v1437_v12  ;;  %2360 = vpow2.f32 %v2196_v49  ;;  %vm1825_vm1 = vweird.f32 %v2359_v39 }
 0x2e7   :  { %v1817_v43 = vsel %vm1814_vm15, %v1816_v42, %v1812_v17  ;;  %2362 = vrcp.f32 %v1438_v47  ;;  %v1240_v14 = vpop.xlane.xlu1 %1239  ;;  %vm1826_vm2 = vmor %vm1824_vm0, %vm1825_vm1  ;;  %v1845_v2 = vand.u32 2147483648, %v1438_v47  ;;  %v1843_v62 = vand.u32 2147483647, %v1438_v47 }
 0x2e8   :  { %1949 = vst.msk [vmem:[%s3297_s10 + $0xc0] sm:$0xff] %vm1924_vm4, %v1817_v43  ;;  %v1821_v24 = vsub.f32 1.0, %v1820_v9  ;;  %v1278_v54 = vadd.f32 %v1240_v14, %v3023_v25  ;;  %vm1839_vm6 = vweird.f32 %v1438_v47 }
 0x2e9   :  { %v1846_v30 = vor.u32 1.1754944e-38, %v1845_v2  ;;  %vm1844_vm8 = vcmp.eq.f32.partialorder %v1843_v62, 8.507059e+37 }
 0x2ea   :  { %v1822_v11 = vmul.f32 %v2359_v39, %v1821_v24  ;;  %v1312_v5 = vadd.f32 %v3031_v32, %v1278_v54 }
 0x2ec   :  { %v2361_v20 = vpop.eup %2360  ;;  %v1823_v45 = vadd.f32 %v2359_v39, %v1822_v11  ;;  %v2197_v7 = vmul.f32 -1.442695, %v1312_v5 }
 0x2ed   :  { %v2363_v51 = vpop.eup %2362  ;;  %v1439_v57 = vadd.f32 1.0, %v2361_v20 }
 0x2ee   :  { %v1827_v61 = vsel %vm1826_vm2, %v2359_v39, %v1823_v45  ;;  %v1835_v55 = vmul.f32 %v2363_v51, %v1438_v47  ;;  %2364 = vpow2.f32 %v2197_v7  ;;  %vm1840_vm5 = vweird.f32 %v2363_v51 }
 0x2ef   :  { %v1832_v36 = vsel %vm1829_vm3, %v1831_v60, %v1827_v61  ;;  %2366 = vrcp.f32 %v1439_v57  ;;  %v1243_v25 = vpop.xlane.xlu2 %1242  ;;  %vm1841_vm7 = vmor %vm1839_vm6, %vm1840_vm5  ;;  %v1860_v8 = vand.u32 2147483648, %v1439_v57  ;;  %v1858_v52 = vand.u32 2147483647, %v1439_v57 }
 0x2f0   :  { %1950 = vst.msk [vmem:[%s3297_s10 + $0xc8] sm:$0xff] %vm1924_vm4, %v1832_v36  ;;  %v1836_v59 = vsub.f32 1.0, %v1835_v55  ;;  %v1279_v56 = vadd.f32 %v1243_v25, %v3018_v15  ;;  %vm1854_vm10 = vweird.f32 %v1439_v57 }
 0x2f1   :  { %v1861_v18 = vor.u32 1.1754944e-38, %v1860_v8  ;;  %vm1859_vm12 = vcmp.eq.f32.partialorder %v1858_v52, 8.507059e+37 }
 0x2f2   :  { %v1837_v44 = vmul.f32 %v2363_v51, %v1836_v59  ;;  %v1313_v41 = vadd.f32 %v3031_v32, %v1279_v56 }
 0x2f4   :  { %v2365_v22 = vpop.eup %2364  ;;  %v1838_v4 = vadd.f32 %v2363_v51, %v1837_v44  ;;  %v2198_v16 = vmul.f32 -1.442695, %v1313_v41 }
 0x2f5   :  { %v2367_v53 = vpop.eup %2366  ;;  %v1440_v1 = vadd.f32 1.0, %v2365_v22 }
 0x2f6   :  { %v1842_v13 = vsel %vm1841_vm7, %v2363_v51, %v1838_v4  ;;  %v1850_v19 = vmul.f32 %v2367_v53, %v1439_v57  ;;  %2368 = vpow2.f32 %v2198_v16  ;;  %vm1855_vm9 = vweird.f32 %v2367_v53 }
 0x2f7   :  { %v1847_v27 = vsel %vm1844_vm8, %v1846_v30, %v1842_v13  ;;  %2370 = vrcp.f32 %v1440_v1  ;;  %v1246_v15 = vpop.xlane.xlu0 %1245  ;;  %vm1856_vm11 = vmor %vm1854_vm10, %vm1855_vm9  ;;  %v1875_v35 = vand.u32 2147483648, %v1440_v1  ;;  %v1873_v38 = vand.u32 2147483647, %v1440_v1 }
 0x2f8   :  { %1951 = vst.msk [vmem:[%s3297_s10 + $0xd0] sm:$0xff] %vm1924_vm4, %v1847_v27  ;;  %v1851_v63 = vsub.f32 1.0, %v1850_v19  ;;  %v1280_v21 = vadd.f32 %v1246_v15, %v3025_v28  ;;  %vm1869_vm14 = vweird.f32 %v1440_v1 }
 0x2f9   :  { %v1876_v17 = vor.u32 1.1754944e-38, %v1875_v35  ;;  %vm1874_vm1 = vcmp.eq.f32.partialorder %v1873_v38, 8.507059e+37 }
 0x2fa   :  { %v1852_v0 = vmul.f32 %v2367_v53, %v1851_v63  ;;  %v1314_v23 = vadd.f32 %v3031_v32, %v1280_v21 }
 0x2fc   :  { %v2369_v29 = vpop.eup %2368  ;;  %v1853_v31 = vadd.f32 %v2367_v53, %v1852_v0  ;;  %v2199_v12 = vmul.f32 -1.442695, %v1314_v23 }
 0x2fd   :  { %v2371_v46 = vpop.eup %2370  ;;  %v1441_v26 = vadd.f32 1.0, %v2369_v29 }
 0x2fe   :  { %v1857_v37 = vsel %vm1856_vm11, %v2367_v53, %v1853_v31  ;;  %v1865_v3 = vmul.f32 %v2371_v46, %v1440_v1  ;;  %2372 = vpow2.f32 %v2199_v12  ;;  %vm1870_vm13 = vweird.f32 %v2371_v46 }
 0x2ff   :  { %v1862_v33 = vsel %vm1859_vm12, %v1861_v18, %v1857_v37  ;;  %2374 = vrcp.f32 %v1441_v26  ;;  %v1249_v28 = vpop.xlane.xlu1 %1248  ;;  %vm1871_vm15 = vmor %vm1869_vm14, %vm1870_vm13  ;;  %v1888_v48 = vand.u32 2147483647, %v1441_v26  ;;  %vm1884_vm2 = vweird.f32 %v1441_v26 }
 0x300   :  { %1952 = vst.msk [vmem:[%s3297_s10 + $0xd8] sm:$0xff] %vm1924_vm4, %v1862_v33  ;;  %v1866_v58 = vsub.f32 1.0, %v1865_v3  ;;  %v1281_v34 = vadd.f32 %v1249_v28, %v3037_v10  ;;  %v1890_v10 = vand.u32 2147483648, %v1441_v26 }
 0x301   :  { %vm1889_vm5 = vcmp.eq.f32.partialorder %v1888_v48, 8.507059e+37 }
 0x302   :  { %v1867_v40 = vmul.f32 %v2371_v46, %v1866_v58  ;;  %v1315_v6 = vadd.f32 %v3031_v32, %v1281_v34  ;;  %v1891_v20 = vor.u32 1.1754944e-38, %v1890_v10 }
 0x304   :  { %v2373_v49 = vpop.eup %2372  ;;  %v1868_v39 = vadd.f32 %v2371_v46, %v1867_v40  ;;  %v2200_v42 = vmul.f32 -1.442695, %v1315_v6 }
 0x305   :  { %v2375_v47 = vpop.eup %2374  ;;  %v1442_v9 = vadd.f32 1.0, %v2373_v49 }
 0x306   :  { %v1872_v43 = vsel %vm1871_vm15, %v2371_v46, %v1868_v39  ;;  %v1880_v14 = vmul.f32 %v2375_v47, %v1441_v26  ;;  %2376 = vpow2.f32 %v2200_v42  ;;  %vm1885_vm0 = vweird.f32 %v2375_v47 }
 0x307   :  { %v1877_v24 = vsel %vm1874_vm1, %v1876_v17, %v1872_v43  ;;  %2378 = vrcp.f32 %v1442_v9  ;;  %vm1886_vm3 = vmor %vm1884_vm2, %vm1885_vm0  ;;  %v1905_v61 = vand.u32 2147483648, %v1442_v9  ;;  %v1903_v36 = vand.u32 2147483647, %v1442_v9 }
 0x308   :  { %1953 = vst.msk [vmem:[%s3297_s10 + $0xe0] sm:$0xff] %vm1924_vm4, %v1877_v24  ;;  %v1881_v32 = vsub.f32 1.0, %v1880_v14  ;;  %vm1899_vm7 = vweird.f32 %v1442_v9 }
 0x309   :  { %v1906_v56 = vor.u32 1.1754944e-38, %v1905_v61  ;;  %vm1904_vm9 = vcmp.eq.f32.partialorder %v1903_v36, 8.507059e+37 }
 0x30a   :  { %v1882_v54 = vmul.f32 %v2375_v47, %v1881_v32 }
 0x30c   :  { %v2377_v11 = vpop.eup %2376  ;;  %v1883_v50 = vadd.f32 %v2375_v47, %v1882_v54 }
 0x30d   :  { %v2379_v5 = vpop.eup %2378  ;;  %v1443_v45 = vadd.f32 1.0, %v2377_v11 }
 0x30e   :  { %v1887_v7 = vsel %vm1886_vm3, %v2375_v47, %v1883_v50  ;;  %v1895_v51 = vmul.f32 %v2379_v5, %v1442_v9  ;;  %vm1900_vm6 = vweird.f32 %v2379_v5 }
 0x30f   :  { %v1892_v60 = vsel %vm1889_vm5, %v1891_v20, %v1887_v7  ;;  %2380 = vrcp.f32 %v1443_v45  ;;  %vm1901_vm8 = vmor %vm1899_vm7, %vm1900_vm6  ;;  %v1920_v22 = vand.u32 2147483648, %v1443_v45  ;;  %v1918_v16 = vand.u32 2147483647, %v1443_v45 }
 0x310   :  { %1954 = vst.msk [vmem:[%s3297_s10 + $0xe8] sm:$0xff] %vm1924_vm4, %v1892_v60  ;;  %v1896_v57 = vsub.f32 1.0, %v1895_v51  ;;  %vm1914_vm11 = vweird.f32 %v1443_v45 }
 0x311   :  { %v1921_v30 = vor.u32 1.1754944e-38, %v1920_v22  ;;  %vm1919_vm13 = vcmp.eq.f32.partialorder %v1918_v16, 8.507059e+37 }
 0x312   :  { %v1897_v55 = vmul.f32 %v2379_v5, %v1896_v57 }
 0x314   :  { %v1898_v25 = vadd.f32 %v2379_v5, %v1897_v55 }
 0x315   :  { %v2381_v59 = vpop.eup %2380 }
 0x316   :  { %v1902_v2 = vsel %vm1901_vm8, %v2379_v5, %v1898_v25  ;;  %v1910_v44 = vmul.f32 %v2381_v59, %v1443_v45  ;;  %vm1915_vm10 = vweird.f32 %v2381_v59 }
 0x317   :  { %v1907_v62 = vsel %vm1904_vm9, %v1906_v56, %v1902_v2  ;;  %vm1916_vm12 = vmor %vm1914_vm11, %vm1915_vm10 }
 0x318   :  { %1955 = vst.msk [vmem:[%s3297_s10 + $0xf0] sm:$0xff] %vm1924_vm4, %v1907_v62  ;;  %v1911_v41 = vsub.f32 1.0, %v1910_v44 }
 0x31a   :  { %v1912_v4 = vmul.f32 %v2381_v59, %v1911_v41 }
 0x31c   :  { %v1913_v53 = vadd.f32 %v2381_v59, %v1912_v4 }
 0x31e   :  { %v1917_v1 = vsel %vm1916_vm12, %v2381_v59, %v1913_v53 }
 0x31f   :  { %v1922_v13 = vsel %vm1919_vm13, %v1921_v30, %v1917_v1 }
 0x320   :  { %1956 = vst.msk [vmem:[%s3297_s10 + $0xf8] sm:$0xff] %vm1924_vm4, %v1922_v13 }

</bundles_post_ra>
